<compile_context>
chip_gen: v7x
topology: tpu7x:2x2x1
jax: 0.10.0
libtpu: 0.0.40
codegen_flags: <defaults>
</compile_context>

<pallas_src>
import functools

import jax
import jax.numpy as jnp
import numpy as np
from jax import lax
from jax.experimental import pallas as pl
from jax.experimental.pallas import tpu as pltpu


# --------------------------------------------------------------------------- #
# One-time probe: does pltpu.roll lower here, and which direction is it?
# --------------------------------------------------------------------------- #
def _probe_roll_support():
    """Returns (use_roll, matches_jnp_roll).

    Falls back to slice+concat lane shifts if the bf16 lane rotate does not
    lower / behaves unexpectedly on this backend.
    """
    try:
        def probe(o_ref):
            x = lax.broadcasted_iota(jnp.float32, (8, 128), 1)
            o_ref[...] = pltpu.roll(x.astype(jnp.bfloat16), 1, axis=1)

        out = pl.pallas_call(
            probe, out_shape=jax.ShapeDtypeStruct((8, 128), jnp.bfloat16))()
        first = float(np.asarray(out)[0, 0])
        if first == 127.0:   # out[i] = in[(i - shift) % n]  (jnp.roll convention)
            return True, True
        if first == 1.0:     # out[i] = in[(i + shift) % n]
            return True, False
        return False, True   # unexpected -> safe fallback
    except Exception:
        return False, True


# --------------------------------------------------------------------------- #
# Pallas kernel
# --------------------------------------------------------------------------- #
def _make_kernel(H, W, Cin, C, depth, K, Bt, use_roll, roll_matches_jnp):
    P = (K - 1) // 2            # 'same' padding (odd kernel, stride 1)
    HW = H * W
    N = Bt * HW                 # folded lane width

    def lane_shift(t, s):
        """Return u with u[:, p] = t[:, (p + s) % N] for a static int shift s."""
        s = s % N
        if s == 0:
            return t
        if use_roll:
            shift = (N - s) % N if roll_matches_jnp else s
            return pltpu.roll(t, shift, axis=1)
        return jnp.concatenate([t[:, s:], t[:, :s]], axis=1)

    def kernel(x_ref, m_ref, mask_ref, w1_ref, b1_ref, wd_ref, bd_ref,
               wo_ref, bo_ref, out_ref, patch_ref):
        # ---- reverse attention gate: x * (1 - sigmoid(map)) (bf16 VPU) ----
        m = m_ref[0]                                          # (1, N) f32
        rmap = (1.0 - jax.nn.sigmoid(m)).astype(jnp.bfloat16)
        xg = x_ref[0] * rmap                                  # (Cin, N) bf16

        # ---- 1x1 conv (BN scale folded into weights) + bias ----
        h = jnp.dot(w1_ref[...], xg,
                    preferred_element_type=jnp.float32)       # (C, N) f32
        h = h + b1_ref[...]                                   # (C, 1) broadcast

        # ---- depth x (KxK 'same' conv + BN + ReLU): one fused matmul each ----
        # TODO(synk): for large depth switch this static unroll to lax.fori_loop
        # over d (wd_ref[d]/bd_ref[d] support dynamic indexing) to bound live
        # ranges; at depth=2 static unroll is the right choice.
        for d in range(depth):
            h_bf = h.astype(jnp.bfloat16)                     # one cast / layer
            for ky in range(K):
                for kx in range(K):
                    tap = ky * K + kx
                    s = (ky - P) * W + (kx - P)               # flat spatial shift
                    t = lane_shift(h_bf, s)                   # (C, N) bf16
                    if not (ky == P and kx == P):             # center tap: no mask
                        t = t * mask_ref[pl.ds(tap, 1), :]    # bf16 border mask
                    patch_ref[pl.ds(tap * C, C), :] = t
            acc = jnp.dot(wd_ref[d], patch_ref[...],
                          preferred_element_type=jnp.float32)  # (C, N) f32
            h = jnp.maximum(acc + bd_ref[d], 0.0)             # bias + ReLU

        # ---- conv_out: C -> 1 channel as VPU mul + sublane reduce (M=1 would
        #      waste the MXU), + BN bias + map residual ----
        o = jnp.sum(h * wo_ref[...], axis=0, keepdims=True)   # (1, N) f32
        out_ref[0] = o + bo_ref[0] + m

    return kernel


# --------------------------------------------------------------------------- #
# Wrapper
# --------------------------------------------------------------------------- #
def _pick_batch_tile(B, HW, target_lanes=2048):
    """Fold Bt images into the lane axis; keep >= 2 grid steps when possible
    (v7x has 2 TensorCores) and require Bt | B."""
    bt = max(1, min(B, target_lanes // max(HW, 1)))
    while bt > 1 and B // bt < 2:
        bt -= 1
    while B % bt:
        bt -= 1
    return bt


def _build_tap_masks(H, W, K, Bt):
    """Per-tap border-validity masks, tiled Bt x along the lane axis: (K*K, Bt*HW)."""
    P = (K - 1) // 2
    HW = H * W
    yy, xx = np.mgrid[0:H, 0:W]
    rows = []
    for ky in range(K):
        for kx in range(K):
            dy, dx = ky - P, kx - P
            valid = ((yy + dy >= 0) & (yy + dy < H) &
                     (xx + dx >= 0) & (xx + dx < W))
            rows.append(valid.reshape(HW))
    m = np.stack(rows).astype(np.float32)                 # (K*K, HW)
    return jnp.asarray(np.tile(m, (1, Bt)), dtype=jnp.bfloat16)


def make_reverse_attention(H, W, Cin, C, depth, K, batch_tile=None):
    HW = H * W
    use_roll, roll_matches_jnp = _probe_roll_support()

    @jax.jit
    def forward(x_nchw, map_nchw, w1_oihw, s1, b1, wd_oihw, sd, bd,
                wo_oihw, so, bo):
        B = x_nchw.shape[0]
        Bt = batch_tile if batch_tile is not None else _pick_batch_tile(B, HW)
        assert B % Bt == 0, "batch tile must divide batch"
        G = B // Bt
        N = Bt * HW

        kernel = _make_kernel(H, W, Cin, C, depth, K, Bt,
                              use_roll, roll_matches_jnp)
        masks = _build_tap_masks(H, W, K, Bt)                 # (K*K, N) bf16

        # TODO(synk): bilinear interpolate (align_corners=False) is XLA glue via
        # jax.image.resize; it is not part of the Pallas kernel.
        map_i = jax.image.resize(map_nchw.astype(jnp.float32),
                                 (B, 1, H, W), method='bilinear')

        # Fold Bt images into the lane axis: lane index = bt*HW + (y*W + x).
        x_f = (x_nchw.astype(jnp.bfloat16)
               .reshape(G, Bt, Cin, HW).transpose(0, 2, 1, 3).reshape(G, Cin, N))
        m_f = (map_i.reshape(G, Bt, 1, HW)
               .transpose(0, 2, 1, 3).reshape(G, 1, N))

        # Fold BN scales into conv weights (inference); keep biases; bf16 weights.
        w1f = (w1_oihw[:, :, 0, 0] * s1[:, None]).astype(jnp.bfloat16)   # (C, Cin)
        b1f = b1.reshape(C, 1).astype(jnp.float32)
        # (d,O,I,K,K) -> (d,O,ky,kx,I) -> (d, C, K*K*C), row order tap*C + cin
        wdf = (jnp.transpose(wd_oihw, (0, 1, 3, 4, 2)).reshape(depth, C, K * K * C)
               * sd[:, :, None]).astype(jnp.bfloat16)
        bdf = bd.reshape(depth, C, 1).astype(jnp.float32)
        wof = (wo_oihw[:, :, 0, 0] * so[:, None]).reshape(C, 1).astype(jnp.float32)
        bof = bo.reshape(1).astype(jnp.float32)                          # SMEM scalar

        out = pl.pallas_call(
            kernel,
            out_shape=jax.ShapeDtypeStruct((G, 1, N), jnp.float32),
            grid_spec=pltpu.PrefetchScalarGridSpec(
                num_scalar_prefetch=0,
                grid=(G,),
                in_specs=[
                    pl.BlockSpec((1, Cin, N), lambda g: (g, 0, 0)),       # x (bf16)
                    pl.BlockSpec((1, 1, N),   lambda g: (g, 0, 0)),       # map (f32)
                    # Grid-invariant operands: whole-array VMEM (single buffer).
                    pl.BlockSpec(memory_space=pltpu.MemorySpace.VMEM),    # tap masks
                    pl.BlockSpec(memory_space=pltpu.MemorySpace.VMEM),    # w1
                    pl.BlockSpec(memory_space=pltpu.MemorySpace.VMEM),    # b1
                    pl.BlockSpec(memory_space=pltpu.MemorySpace.VMEM),    # wd
                    pl.BlockSpec(memory_space=pltpu.MemorySpace.VMEM),    # bd
                    pl.BlockSpec(memory_space=pltpu.MemorySpace.VMEM),    # wo
                    pl.BlockSpec(memory_space=pltpu.MemorySpace.SMEM),    # bo scalar
                ],
                out_specs=pl.BlockSpec((1, 1, N), lambda g: (g, 0, 0)),
                scratch_shapes=[pltpu.VMEM((K * K * C, N), jnp.bfloat16)],
            ),
            compiler_params=pltpu.CompilerParams(
                dimension_semantics=("parallel",)),
        )(x_f, m_f, masks, w1f, b1f, wdf, bdf, wof, bof)

        # Unfold Bt images back out of the lane axis -> NCHW (B, 1, H, W).
        return (out.reshape(G, 1, Bt, HW)
                .transpose(0, 2, 1, 3).reshape(B, 1, H, W))

    return forward


# --------------------------------------------------------------------------- #
# Deterministic BN parameter construction (inference scale/bias)
# --------------------------------------------------------------------------- #
def bn_affine(key, n, eps=1e-5):
    kg, kb, km, kv = jax.random.split(key, 4)
    gamma = jax.random.uniform(kg, (n,), jnp.float32, 0.5, 1.5)
    beta = jax.random.normal(kb, (n,), jnp.float32) * 0.1
    mean = jax.random.normal(km, (n,), jnp.float32) * 0.1
    var = jax.random.uniform(kv, (n,), jnp.float32, 0.5, 1.5)
    scale = gamma / jnp.sqrt(var + eps)
    bias = beta - mean * scale
    return scale, bias


# --------------------------------------------------------------------------- #
# Pure-JAX (XLA) NCHW reference for correctness verification
# --------------------------------------------------------------------------- #
def reference_nchw(x, m, w1, s1, b1, wd, sd, bd, wo, so, bo, depth):
    dn = ('NCHW', 'OIHW', 'NCHW')
    rmap = 1.0 - jax.nn.sigmoid(m)
    h = x * rmap
    h = lax.conv_general_dilated(h, w1, (1, 1), 'SAME', dimension_numbers=dn)
    h = h * s1.reshape(1, -1, 1, 1) + b1.reshape(1, -1, 1, 1)
    for d in range(depth):
        h = lax.conv_general_dilated(h, wd[d], (1, 1), 'SAME', dimension_numbers=dn)
        h = h * sd[d].reshape(1, -1, 1, 1) + bd[d].reshape(1, -1, 1, 1)
        h = jnp.maximum(h, 0.0)
    o = lax.conv_general_dilated(h, wo, (1, 1), 'SAME', dimension_numbers=dn)
    o = o * so.reshape(1, 1, 1, 1) + bo.reshape(1, 1, 1, 1)
    return o + m


# --------------------------------------------------------------------------- #
if __name__ == "__main__":
    B, Cin, C, depth, K = 4, 8, 16, 2, 3      # B=4 exercises batch folding (Bt=2)
    H = W = 16
    mh = mw = 8  # low-res attention map, exercises bilinear upsampling

    key = jax.random.PRNGKey(0)
    ks = jax.random.split(key, 10)

    # inputs (PyTorch convention: NCHW)
    x = jax.random.normal(ks[0], (B, Cin, H, W), jnp.float32)
    mp = jax.random.normal(ks[1], (B, 1, mh, mw), jnp.float32)

    # conv (1x1, in->C) + BN
    w1 = jax.random.normal(ks[2], (C, Cin, 1, 1), jnp.float32) * 0.2
    s1, b1 = bn_affine(ks[3], C)

    # depth x (KxK conv + BN + ReLU), OIHW weights
    wd = jax.random.normal(ks[4], (depth, C, C, K, K), jnp.float32) * 0.1
    sd_l, bd_l = zip(*[bn_affine(jax.random.fold_in(ks[5], d), C)
                       for d in range(depth)])
    sd = jnp.stack(sd_l)
    bd = jnp.stack(bd_l)

    # conv_out (1x1, C->1) + BN
    wo = jax.random.normal(ks[6], (1, C, 1, 1), jnp.float32) * 0.2
    so, bo = bn_affine(ks[7], 1)

    # run Pallas kernel
    fwd = make_reverse_attention(H, W, Cin, C, depth, K)
    out = jax.block_until_ready(fwd(x, mp, w1, s1, b1, wd, sd, bd, wo, so, bo))
    assert out.shape == (B, 1, H, W)

    # verify against XLA reference (bf16 activations/weights on MXU -> loosened tol)
    map_i = jax.image.resize(mp, (B, 1, H, W), method='bilinear')
    ref = reference_nchw(x, map_i, w1, s1, b1, wd, sd, bd, wo, so, bo, depth)
    np.testing.assert_allclose(np.asarray(out), np.asarray(ref),
                               rtol=5e-2, atol=7e-2)
    print("KERNEL_OK")
</pallas_src>

<mosaic_0001>
module attributes {stable_mosaic.version = 11 : i64} {
  func.func @kernel(%arg0: i32, %arg1: memref<1x8x512xbf16, #tpu.memory_space<vmem>>, %arg2: memref<1x1x512xf32, #tpu.memory_space<vmem>>, %arg3: memref<9x512xbf16, #tpu.memory_space<vmem>>, %arg4: memref<16x8xbf16, #tpu.memory_space<vmem>>, %arg5: memref<16x1xf32, #tpu.memory_space<vmem>>, %arg6: memref<2x16x144xbf16, #tpu.memory_space<vmem>>, %arg7: memref<2x16x1xf32, #tpu.memory_space<vmem>>, %arg8: memref<16x1xf32, #tpu.memory_space<vmem>>, %arg9: memref<1xf32, #tpu.memory_space<smem>>, %arg10: memref<1x1x512xf32, #tpu.memory_space<vmem>>, %arg11: memref<144x512xbf16, #tpu.memory_space<vmem>>) attributes {dimension_semantics = [#tpu.dimension_semantics<parallel>], iteration_bounds = array<i64: 2>, scalar_prefetch = 0 : i64, scratch_operands = 1 : i64, tpu.core_type = #tpu.core_type<tc>, window_params = [{transform_indices = @transform_0, window_bounds = array<i64: 1, 8, 512>}, {transform_indices = @transform_1, window_bounds = array<i64: 1, 1, 512>}, {pipeline_mode = #tpu.pipeline_mode<synchronous>, transform_indices = @transform_2, window_bounds = array<i64: 9, 512>}, {pipeline_mode = #tpu.pipeline_mode<synchronous>, transform_indices = @transform_3, window_bounds = array<i64: 16, 8>}, {pipeline_mode = #tpu.pipeline_mode<synchronous>, transform_indices = @transform_4, window_bounds = array<i64: 16, 1>}, {pipeline_mode = #tpu.pipeline_mode<synchronous>, transform_indices = @transform_5, window_bounds = array<i64: 2, 16, 144>}, {pipeline_mode = #tpu.pipeline_mode<synchronous>, transform_indices = @transform_6, window_bounds = array<i64: 2, 16, 1>}, {pipeline_mode = #tpu.pipeline_mode<synchronous>, transform_indices = @transform_7, window_bounds = array<i64: 16, 1>}, {transform_indices = @transform_8, window_bounds = array<i64: 1>}, {transform_indices = @transform_9, window_bounds = array<i64: 1, 1, 512>}]} {
    %c0 = arith.constant 0 : index
    %c0_0 = arith.constant 0 : index
    %c0_1 = arith.constant 0 : index
    %0 = vector.load %arg2[%c0, %c0_0, %c0_1] : memref<1x1x512xf32, #tpu.memory_space<vmem>>, vector<1x1x512xf32>
    %1 = vector.shape_cast %0 : vector<1x1x512xf32> to vector<1x512xf32>
    %2 = arith.negf %1 : vector<1x512xf32>
    %3 = math.exp %2 : vector<1x512xf32>
    %cst = arith.constant 1.000000e+00 : f32
    %4 = vector.broadcast %cst : f32 to vector<1x512xf32>
    %5 = arith.addf %4, %3 : vector<1x512xf32>
    %6 = arith.divf %4, %5 : vector<1x512xf32>
    %cst_2 = arith.constant 1.000000e+00 : f32
    %7 = vector.broadcast %cst_2 : f32 to vector<1x512xf32>
    %8 = arith.subf %7, %6 : vector<1x512xf32>
    %9 = arith.truncf %8 : vector<1x512xf32> to vector<1x512xbf16>
    %c0_3 = arith.constant 0 : index
    %c0_4 = arith.constant 0 : index
    %c0_5 = arith.constant 0 : index
    %10 = vector.load %arg1[%c0_3, %c0_4, %c0_5] : memref<1x8x512xbf16, #tpu.memory_space<vmem>>, vector<1x8x512xbf16>
    %11 = vector.shape_cast %10 : vector<1x8x512xbf16> to vector<8x512xbf16>
    %12 = vector.broadcast %9 : vector<1x512xbf16> to vector<8x512xbf16>
    %13 = arith.mulf %11, %12 : vector<8x512xbf16>
    %c0_6 = arith.constant 0 : index
    %c0_7 = arith.constant 0 : index
    %14 = vector.load %arg4[%c0_6, %c0_7] : memref<16x8xbf16, #tpu.memory_space<vmem>>, vector<16x8xbf16>
    %cst_8 = arith.constant dense<0.000000e+00> : vector<16x512xf32>
    %15 = tpu.matmul %14, %13, %cst_8 {dimension_numbers = #tpu.dot_dimension_numbers<[1], [0], [0], [1], [0, 0, 1, 1], [], []>} : vector<16x8xbf16>, vector<8x512xbf16>, vector<16x512xf32> -> vector<16x512xf32>
    %c0_9 = arith.constant 0 : index
    %c0_10 = arith.constant 0 : index
    %16 = vector.load %arg5[%c0_9, %c0_10] : memref<16x1xf32, #tpu.memory_space<vmem>>, vector<16x1xf32>
    %17 = vector.broadcast %16 : vector<16x1xf32> to vector<16x512xf32>
    %18 = arith.addf %15, %17 : vector<16x512xf32>
    %19 = arith.truncf %18 : vector<16x512xf32> to vector<16x512xbf16>
    %20 = vector.extract_strided_slice %19 {offsets = [0, 495], sizes = [16, 17], strides = [1, 1]} : vector<16x512xbf16> to vector<16x17xbf16>
    %21 = vector.extract_strided_slice %19 {offsets = [0, 0], sizes = [16, 495], strides = [1, 1]} : vector<16x512xbf16> to vector<16x495xbf16>
    %22 = tpu.concatenate %20, %21 in 1 : vector<16x17xbf16>, vector<16x495xbf16> -> vector<16x512xbf16>
    %c0_11 = arith.constant 0 : index
    %c0_12 = arith.constant 0 : index
    %23 = vector.load %arg3[%c0_11, %c0_12] : memref<9x512xbf16, #tpu.memory_space<vmem>>, vector<1x512xbf16>
    %24 = vector.broadcast %23 : vector<1x512xbf16> to vector<16x512xbf16>
    %25 = arith.mulf %22, %24 : vector<16x512xbf16>
    %c0_13 = arith.constant 0 : index
    %c0_14 = arith.constant 0 : index
    %26 = vector.load %arg11[%c0_13, %c0_14] : memref<144x512xbf16, #tpu.memory_space<vmem>>, vector<16x512xbf16>
    tpu.vector_store %arg11[%c0_13, %c0_14], %25 {strides = array<i32>} : memref<144x512xbf16, #tpu.memory_space<vmem>>, vector<16x512xbf16>,
    %27 = vector.extract_strided_slice %19 {offsets = [0, 496], sizes = [16, 16], strides = [1, 1]} : vector<16x512xbf16> to vector<16x16xbf16>
    %28 = vector.extract_strided_slice %19 {offsets = [0, 0], sizes = [16, 496], strides = [1, 1]} : vector<16x512xbf16> to vector<16x496xbf16>
    %29 = tpu.concatenate %27, %28 in 1 : vector<16x16xbf16>, vector<16x496xbf16> -> vector<16x512xbf16>
    %c1 = arith.constant 1 : index
    %c0_15 = arith.constant 0 : index
    %30 = vector.load %arg3[%c1, %c0_15] : memref<9x512xbf16, #tpu.memory_space<vmem>>, vector<1x512xbf16>
    %31 = vector.broadcast %30 : vector<1x512xbf16> to vector<16x512xbf16>
    %32 = arith.mulf %29, %31 : vector<16x512xbf16>
    %c16 = arith.constant 16 : index
    %c0_16 = arith.constant 0 : index
    %33 = vector.load %arg11[%c16, %c0_16] : memref<144x512xbf16, #tpu.memory_space<vmem>>, vector<16x512xbf16>
    tpu.vector_store %arg11[%c16, %c0_16], %32 {strides = array<i32>} : memref<144x512xbf16, #tpu.memory_space<vmem>>, vector<16x512xbf16>,
    %34 = vector.extract_strided_slice %19 {offsets = [0, 497], sizes = [16, 15], strides = [1, 1]} : vector<16x512xbf16> to vector<16x15xbf16>
    %35 = vector.extract_strided_slice %19 {offsets = [0, 0], sizes = [16, 497], strides = [1, 1]} : vector<16x512xbf16> to vector<16x497xbf16>
    %36 = tpu.concatenate %34, %35 in 1 : vector<16x15xbf16>, vector<16x497xbf16> -> vector<16x512xbf16>
    %c2 = arith.constant 2 : index
    %c0_17 = arith.constant 0 : index
    %37 = vector.load %arg3[%c2, %c0_17] : memref<9x512xbf16, #tpu.memory_space<vmem>>, vector<1x512xbf16>
    %38 = vector.broadcast %37 : vector<1x512xbf16> to vector<16x512xbf16>
    %39 = arith.mulf %36, %38 : vector<16x512xbf16>
    %c32 = arith.constant 32 : index
    %c0_18 = arith.constant 0 : index
    %40 = vector.load %arg11[%c32, %c0_18] : memref<144x512xbf16, #tpu.memory_space<vmem>>, vector<16x512xbf16>
    tpu.vector_store %arg11[%c32, %c0_18], %39 {strides = array<i32>} : memref<144x512xbf16, #tpu.memory_space<vmem>>, vector<16x512xbf16>,
    %41 = vector.extract_strided_slice %19 {offsets = [0, 511], sizes = [16, 1], strides = [1, 1]} : vector<16x512xbf16> to vector<16x1xbf16>
    %42 = vector.extract_strided_slice %19 {offsets = [0, 0], sizes = [16, 511], strides = [1, 1]} : vector<16x512xbf16> to vector<16x511xbf16>
    %43 = tpu.concatenate %41, %42 in 1 : vector<16x1xbf16>, vector<16x511xbf16> -> vector<16x512xbf16>
    %c3 = arith.constant 3 : index
    %c0_19 = arith.constant 0 : index
    %44 = vector.load %arg3[%c3, %c0_19] : memref<9x512xbf16, #tpu.memory_space<vmem>>, vector<1x512xbf16>
    %45 = vector.broadcast %44 : vector<1x512xbf16> to vector<16x512xbf16>
    %46 = arith.mulf %43, %45 : vector<16x512xbf16>
    %c48 = arith.constant 48 : index
    %c0_20 = arith.constant 0 : index
    %47 = vector.load %arg11[%c48, %c0_20] : memref<144x512xbf16, #tpu.memory_space<vmem>>, vector<16x512xbf16>
    tpu.vector_store %arg11[%c48, %c0_20], %46 {strides = array<i32>} : memref<144x512xbf16, #tpu.memory_space<vmem>>, vector<16x512xbf16>,
    %c64 = arith.constant 64 : index
    %c0_21 = arith.constant 0 : index
    %48 = vector.load %arg11[%c64, %c0_21] : memref<144x512xbf16, #tpu.memory_space<vmem>>, vector<16x512xbf16>
    tpu.vector_store %arg11[%c64, %c0_21], %19 {strides = array<i32>} : memref<144x512xbf16, #tpu.memory_space<vmem>>, vector<16x512xbf16>,
    %49 = vector.extract_strided_slice %19 {offsets = [0, 1], sizes = [16, 511], strides = [1, 1]} : vector<16x512xbf16> to vector<16x511xbf16>
    %50 = vector.extract_strided_slice %19 {offsets = [0, 0], sizes = [16, 1], strides = [1, 1]} : vector<16x512xbf16> to vector<16x1xbf16>
    %51 = tpu.concatenate %49, %50 in 1 : vector<16x511xbf16>, vector<16x1xbf16> -> vector<16x512xbf16>
    %c5 = arith.constant 5 : index
    %c0_22 = arith.constant 0 : index
    %52 = vector.load %arg3[%c5, %c0_22] : memref<9x512xbf16, #tpu.memory_space<vmem>>, vector<1x512xbf16>
    %53 = vector.broadcast %52 : vector<1x512xbf16> to vector<16x512xbf16>
    %54 = arith.mulf %51, %53 : vector<16x512xbf16>
    %c80 = arith.constant 80 : index
    %c0_23 = arith.constant 0 : index
    %55 = vector.load %arg11[%c80, %c0_23] : memref<144x512xbf16, #tpu.memory_space<vmem>>, vector<16x512xbf16>
    tpu.vector_store %arg11[%c80, %c0_23], %54 {strides = array<i32>} : memref<144x512xbf16, #tpu.memory_space<vmem>>, vector<16x512xbf16>,
    %56 = vector.extract_strided_slice %19 {offsets = [0, 15], sizes = [16, 497], strides = [1, 1]} : vector<16x512xbf16> to vector<16x497xbf16>
    %57 = vector.extract_strided_slice %19 {offsets = [0, 0], sizes = [16, 15], strides = [1, 1]} : vector<16x512xbf16> to vector<16x15xbf16>
    %58 = tpu.concatenate %56, %57 in 1 : vector<16x497xbf16>, vector<16x15xbf16> -> vector<16x512xbf16>
    %c6 = arith.constant 6 : index
    %c0_24 = arith.constant 0 : index
    %59 = vector.load %arg3[%c6, %c0_24] : memref<9x512xbf16, #tpu.memory_space<vmem>>, vector<1x512xbf16>
    %60 = vector.broadcast %59 : vector<1x512xbf16> to vector<16x512xbf16>
    %61 = arith.mulf %58, %60 : vector<16x512xbf16>
    %c96 = arith.constant 96 : index
    %c0_25 = arith.constant 0 : index
    %62 = vector.load %arg11[%c96, %c0_25] : memref<144x512xbf16, #tpu.memory_space<vmem>>, vector<16x512xbf16>
    tpu.vector_store %arg11[%c96, %c0_25], %61 {strides = array<i32>} : memref<144x512xbf16, #tpu.memory_space<vmem>>, vector<16x512xbf16>,
    %63 = vector.extract_strided_slice %19 {offsets = [0, 16], sizes = [16, 496], strides = [1, 1]} : vector<16x512xbf16> to vector<16x496xbf16>
    %64 = vector.extract_strided_slice %19 {offsets = [0, 0], sizes = [16, 16], strides = [1, 1]} : vector<16x512xbf16> to vector<16x16xbf16>
    %65 = tpu.concatenate %63, %64 in 1 : vector<16x496xbf16>, vector<16x16xbf16> -> vector<16x512xbf16>
    %c7 = arith.constant 7 : index
    %c0_26 = arith.constant 0 : index
    %66 = vector.load %arg3[%c7, %c0_26] : memref<9x512xbf16, #tpu.memory_space<vmem>>, vector<1x512xbf16>
    %67 = vector.broadcast %66 : vector<1x512xbf16> to vector<16x512xbf16>
    %68 = arith.mulf %65, %67 : vector<16x512xbf16>
    %c112 = arith.constant 112 : index
    %c0_27 = arith.constant 0 : index
    %69 = vector.load %arg11[%c112, %c0_27] : memref<144x512xbf16, #tpu.memory_space<vmem>>, vector<16x512xbf16>
    tpu.vector_store %arg11[%c112, %c0_27], %68 {strides = array<i32>} : memref<144x512xbf16, #tpu.memory_space<vmem>>, vector<16x512xbf16>,
    %70 = vector.extract_strided_slice %19 {offsets = [0, 17], sizes = [16, 495], strides = [1, 1]} : vector<16x512xbf16> to vector<16x495xbf16>
    %71 = vector.extract_strided_slice %19 {offsets = [0, 0], sizes = [16, 17], strides = [1, 1]} : vector<16x512xbf16> to vector<16x17xbf16>
    %72 = tpu.concatenate %70, %71 in 1 : vector<16x495xbf16>, vector<16x17xbf16> -> vector<16x512xbf16>
    %c8 = arith.constant 8 : index
    %c0_28 = arith.constant 0 : index
    %73 = vector.load %arg3[%c8, %c0_28] : memref<9x512xbf16, #tpu.memory_space<vmem>>, vector<1x512xbf16>
    %74 = vector.broadcast %73 : vector<1x512xbf16> to vector<16x512xbf16>
    %75 = arith.mulf %72, %74 : vector<16x512xbf16>
    %c128 = arith.constant 128 : index
    %c0_29 = arith.constant 0 : index
    %76 = vector.load %arg11[%c128, %c0_29] : memref<144x512xbf16, #tpu.memory_space<vmem>>, vector<16x512xbf16>
    tpu.vector_store %arg11[%c128, %c0_29], %75 {strides = array<i32>} : memref<144x512xbf16, #tpu.memory_space<vmem>>, vector<16x512xbf16>,
    %c0_30 = arith.constant 0 : index
    %c0_31 = arith.constant 0 : index
    %c0_32 = arith.constant 0 : index
    %77 = vector.load %arg6[%c0_30, %c0_31, %c0_32] : memref<2x16x144xbf16, #tpu.memory_space<vmem>>, vector<1x16x144xbf16>
    %78 = vector.shape_cast %77 : vector<1x16x144xbf16> to vector<16x144xbf16>
    %c0_33 = arith.constant 0 : index
    %c0_34 = arith.constant 0 : index
    %79 = vector.load %arg11[%c0_33, %c0_34] : memref<144x512xbf16, #tpu.memory_space<vmem>>, vector<144x512xbf16>
    %cst_35 = arith.constant dense<0.000000e+00> : vector<16x512xf32>
    %80 = tpu.matmul %78, %79, %cst_35 {dimension_numbers = #tpu.dot_dimension_numbers<[1], [0], [0], [1], [0, 0, 1, 1], [], []>} : vector<16x144xbf16>, vector<144x512xbf16>, vector<16x512xf32> -> vector<16x512xf32>
    %c0_36 = arith.constant 0 : index
    %c0_37 = arith.constant 0 : index
    %c0_38 = arith.constant 0 : index
    %81 = vector.load %arg7[%c0_36, %c0_37, %c0_38] : memref<2x16x1xf32, #tpu.memory_space<vmem>>, vector<1x16x1xf32>
    %82 = vector.shape_cast %81 : vector<1x16x1xf32> to vector<16x1xf32>
    %83 = vector.broadcast %82 : vector<16x1xf32> to vector<16x512xf32>
    %84 = arith.addf %80, %83 : vector<16x512xf32>
    %cst_39 = arith.constant 0.000000e+00 : f32
    %85 = vector.broadcast %cst_39 : f32 to vector<16x512xf32>
    %86 = arith.maximumf %84, %85 : vector<16x512xf32>
    %87 = arith.truncf %86 : vector<16x512xf32> to vector<16x512xbf16>
    %88 = vector.extract_strided_slice %87 {offsets = [0, 495], sizes = [16, 17], strides = [1, 1]} : vector<16x512xbf16> to vector<16x17xbf16>
    %89 = vector.extract_strided_slice %87 {offsets = [0, 0], sizes = [16, 495], strides = [1, 1]} : vector<16x512xbf16> to vector<16x495xbf16>
    %90 = tpu.concatenate %88, %89 in 1 : vector<16x17xbf16>, vector<16x495xbf16> -> vector<16x512xbf16>
    %c0_40 = arith.constant 0 : index
    %c0_41 = arith.constant 0 : index
    %91 = vector.load %arg3[%c0_40, %c0_41] : memref<9x512xbf16, #tpu.memory_space<vmem>>, vector<1x512xbf16>
    %92 = vector.broadcast %91 : vector<1x512xbf16> to vector<16x512xbf16>
    %93 = arith.mulf %90, %92 : vector<16x512xbf16>
    %c0_42 = arith.constant 0 : index
    %c0_43 = arith.constant 0 : index
    %94 = vector.load %arg11[%c0_42, %c0_43] : memref<144x512xbf16, #tpu.memory_space<vmem>>, vector<16x512xbf16>
    tpu.vector_store %arg11[%c0_42, %c0_43], %93 {strides = array<i32>} : memref<144x512xbf16, #tpu.memory_space<vmem>>, vector<16x512xbf16>,
    %95 = vector.extract_strided_slice %87 {offsets = [0, 496], sizes = [16, 16], strides = [1, 1]} : vector<16x512xbf16> to vector<16x16xbf16>
    %96 = vector.extract_strided_slice %87 {offsets = [0, 0], sizes = [16, 496], strides = [1, 1]} : vector<16x512xbf16> to vector<16x496xbf16>
    %97 = tpu.concatenate %95, %96 in 1 : vector<16x16xbf16>, vector<16x496xbf16> -> vector<16x512xbf16>
    %c1_44 = arith.constant 1 : index
    %c0_45 = arith.constant 0 : index
    %98 = vector.load %arg3[%c1_44, %c0_45] : memref<9x512xbf16, #tpu.memory_space<vmem>>, vector<1x512xbf16>
    %99 = vector.broadcast %98 : vector<1x512xbf16> to vector<16x512xbf16>
    %100 = arith.mulf %97, %99 : vector<16x512xbf16>
    %c16_46 = arith.constant 16 : index
    %c0_47 = arith.constant 0 : index
    %101 = vector.load %arg11[%c16_46, %c0_47] : memref<144x512xbf16, #tpu.memory_space<vmem>>, vector<16x512xbf16>
    tpu.vector_store %arg11[%c16_46, %c0_47], %100 {strides = array<i32>} : memref<144x512xbf16, #tpu.memory_space<vmem>>, vector<16x512xbf16>,
    %102 = vector.extract_strided_slice %87 {offsets = [0, 497], sizes = [16, 15], strides = [1, 1]} : vector<16x512xbf16> to vector<16x15xbf16>
    %103 = vector.extract_strided_slice %87 {offsets = [0, 0], sizes = [16, 497], strides = [1, 1]} : vector<16x512xbf16> to vector<16x497xbf16>
    %104 = tpu.concatenate %102, %103 in 1 : vector<16x15xbf16>, vector<16x497xbf16> -> vector<16x512xbf16>
    %c2_48 = arith.constant 2 : index
    %c0_49 = arith.constant 0 : index
    %105 = vector.load %arg3[%c2_48, %c0_49] : memref<9x512xbf16, #tpu.memory_space<vmem>>, vector<1x512xbf16>
    %106 = vector.broadcast %105 : vector<1x512xbf16> to vector<16x512xbf16>
    %107 = arith.mulf %104, %106 : vector<16x512xbf16>
    %c32_50 = arith.constant 32 : index
    %c0_51 = arith.constant 0 : index
    %108 = vector.load %arg11[%c32_50, %c0_51] : memref<144x512xbf16, #tpu.memory_space<vmem>>, vector<16x512xbf16>
    tpu.vector_store %arg11[%c32_50, %c0_51], %107 {strides = array<i32>} : memref<144x512xbf16, #tpu.memory_space<vmem>>, vector<16x512xbf16>,
    %109 = vector.extract_strided_slice %87 {offsets = [0, 511], sizes = [16, 1], strides = [1, 1]} : vector<16x512xbf16> to vector<16x1xbf16>
    %110 = vector.extract_strided_slice %87 {offsets = [0, 0], sizes = [16, 511], strides = [1, 1]} : vector<16x512xbf16> to vector<16x511xbf16>
    %111 = tpu.concatenate %109, %110 in 1 : vector<16x1xbf16>, vector<16x511xbf16> -> vector<16x512xbf16>
    %c3_52 = arith.constant 3 : index
    %c0_53 = arith.constant 0 : index
    %112 = vector.load %arg3[%c3_52, %c0_53] : memref<9x512xbf16, #tpu.memory_space<vmem>>, vector<1x512xbf16>
    %113 = vector.broadcast %112 : vector<1x512xbf16> to vector<16x512xbf16>
    %114 = arith.mulf %111, %113 : vector<16x512xbf16>
    %c48_54 = arith.constant 48 : index
    %c0_55 = arith.constant 0 : index
    %115 = vector.load %arg11[%c48_54, %c0_55] : memref<144x512xbf16, #tpu.memory_space<vmem>>, vector<16x512xbf16>
    tpu.vector_store %arg11[%c48_54, %c0_55], %114 {strides = array<i32>} : memref<144x512xbf16, #tpu.memory_space<vmem>>, vector<16x512xbf16>,
    %c64_56 = arith.constant 64 : index
    %c0_57 = arith.constant 0 : index
    %116 = vector.load %arg11[%c64_56, %c0_57] : memref<144x512xbf16, #tpu.memory_space<vmem>>, vector<16x512xbf16>
    tpu.vector_store %arg11[%c64_56, %c0_57], %87 {strides = array<i32>} : memref<144x512xbf16, #tpu.memory_space<vmem>>, vector<16x512xbf16>,
    %117 = vector.extract_strided_slice %87 {offsets = [0, 1], sizes = [16, 511], strides = [1, 1]} : vector<16x512xbf16> to vector<16x511xbf16>
    %118 = vector.extract_strided_slice %87 {offsets = [0, 0], sizes = [16, 1], strides = [1, 1]} : vector<16x512xbf16> to vector<16x1xbf16>
    %119 = tpu.concatenate %117, %118 in 1 : vector<16x511xbf16>, vector<16x1xbf16> -> vector<16x512xbf16>
    %c5_58 = arith.constant 5 : index
    %c0_59 = arith.constant 0 : index
    %120 = vector.load %arg3[%c5_58, %c0_59] : memref<9x512xbf16, #tpu.memory_space<vmem>>, vector<1x512xbf16>
    %121 = vector.broadcast %120 : vector<1x512xbf16> to vector<16x512xbf16>
    %122 = arith.mulf %119, %121 : vector<16x512xbf16>
    %c80_60 = arith.constant 80 : index
    %c0_61 = arith.constant 0 : index
    %123 = vector.load %arg11[%c80_60, %c0_61] : memref<144x512xbf16, #tpu.memory_space<vmem>>, vector<16x512xbf16>
    tpu.vector_store %arg11[%c80_60, %c0_61], %122 {strides = array<i32>} : memref<144x512xbf16, #tpu.memory_space<vmem>>, vector<16x512xbf16>,
    %124 = vector.extract_strided_slice %87 {offsets = [0, 15], sizes = [16, 497], strides = [1, 1]} : vector<16x512xbf16> to vector<16x497xbf16>
    %125 = vector.extract_strided_slice %87 {offsets = [0, 0], sizes = [16, 15], strides = [1, 1]} : vector<16x512xbf16> to vector<16x15xbf16>
    %126 = tpu.concatenate %124, %125 in 1 : vector<16x497xbf16>, vector<16x15xbf16> -> vector<16x512xbf16>
    %c6_62 = arith.constant 6 : index
    %c0_63 = arith.constant 0 : index
    %127 = vector.load %arg3[%c6_62, %c0_63] : memref<9x512xbf16, #tpu.memory_space<vmem>>, vector<1x512xbf16>
    %128 = vector.broadcast %127 : vector<1x512xbf16> to vector<16x512xbf16>
    %129 = arith.mulf %126, %128 : vector<16x512xbf16>
    %c96_64 = arith.constant 96 : index
    %c0_65 = arith.constant 0 : index
    %130 = vector.load %arg11[%c96_64, %c0_65] : memref<144x512xbf16, #tpu.memory_space<vmem>>, vector<16x512xbf16>
    tpu.vector_store %arg11[%c96_64, %c0_65], %129 {strides = array<i32>} : memref<144x512xbf16, #tpu.memory_space<vmem>>, vector<16x512xbf16>,
    %131 = vector.extract_strided_slice %87 {offsets = [0, 16], sizes = [16, 496], strides = [1, 1]} : vector<16x512xbf16> to vector<16x496xbf16>
    %132 = vector.extract_strided_slice %87 {offsets = [0, 0], sizes = [16, 16], strides = [1, 1]} : vector<16x512xbf16> to vector<16x16xbf16>
    %133 = tpu.concatenate %131, %132 in 1 : vector<16x496xbf16>, vector<16x16xbf16> -> vector<16x512xbf16>
    %c7_66 = arith.constant 7 : index
    %c0_67 = arith.constant 0 : index
    %134 = vector.load %arg3[%c7_66, %c0_67] : memref<9x512xbf16, #tpu.memory_space<vmem>>, vector<1x512xbf16>
    %135 = vector.broadcast %134 : vector<1x512xbf16> to vector<16x512xbf16>
    %136 = arith.mulf %133, %135 : vector<16x512xbf16>
    %c112_68 = arith.constant 112 : index
    %c0_69 = arith.constant 0 : index
    %137 = vector.load %arg11[%c112_68, %c0_69] : memref<144x512xbf16, #tpu.memory_space<vmem>>, vector<16x512xbf16>
    tpu.vector_store %arg11[%c112_68, %c0_69], %136 {strides = array<i32>} : memref<144x512xbf16, #tpu.memory_space<vmem>>, vector<16x512xbf16>,
    %138 = vector.extract_strided_slice %87 {offsets = [0, 17], sizes = [16, 495], strides = [1, 1]} : vector<16x512xbf16> to vector<16x495xbf16>
    %139 = vector.extract_strided_slice %87 {offsets = [0, 0], sizes = [16, 17], strides = [1, 1]} : vector<16x512xbf16> to vector<16x17xbf16>
    %140 = tpu.concatenate %138, %139 in 1 : vector<16x495xbf16>, vector<16x17xbf16> -> vector<16x512xbf16>
    %c8_70 = arith.constant 8 : index
    %c0_71 = arith.constant 0 : index
    %141 = vector.load %arg3[%c8_70, %c0_71] : memref<9x512xbf16, #tpu.memory_space<vmem>>, vector<1x512xbf16>
    %142 = vector.broadcast %141 : vector<1x512xbf16> to vector<16x512xbf16>
    %143 = arith.mulf %140, %142 : vector<16x512xbf16>
    %c128_72 = arith.constant 128 : index
    %c0_73 = arith.constant 0 : index
    %144 = vector.load %arg11[%c128_72, %c0_73] : memref<144x512xbf16, #tpu.memory_space<vmem>>, vector<16x512xbf16>
    tpu.vector_store %arg11[%c128_72, %c0_73], %143 {strides = array<i32>} : memref<144x512xbf16, #tpu.memory_space<vmem>>, vector<16x512xbf16>,
    %c1_74 = arith.constant 1 : index
    %c0_75 = arith.constant 0 : index
    %c0_76 = arith.constant 0 : index
    %145 = vector.load %arg6[%c1_74, %c0_75, %c0_76] : memref<2x16x144xbf16, #tpu.memory_space<vmem>>, vector<1x16x144xbf16>
    %146 = vector.shape_cast %145 : vector<1x16x144xbf16> to vector<16x144xbf16>
    %c0_77 = arith.constant 0 : index
    %c0_78 = arith.constant 0 : index
    %147 = vector.load %arg11[%c0_77, %c0_78] : memref<144x512xbf16, #tpu.memory_space<vmem>>, vector<144x512xbf16>
    %cst_79 = arith.constant dense<0.000000e+00> : vector<16x512xf32>
    %148 = tpu.matmul %146, %147, %cst_79 {dimension_numbers = #tpu.dot_dimension_numbers<[1], [0], [0], [1], [0, 0, 1, 1], [], []>} : vector<16x144xbf16>, vector<144x512xbf16>, vector<16x512xf32> -> vector<16x512xf32>
    %c1_80 = arith.constant 1 : index
    %c0_81 = arith.constant 0 : index
    %c0_82 = arith.constant 0 : index
    %149 = vector.load %arg7[%c1_80, %c0_81, %c0_82] : memref<2x16x1xf32, #tpu.memory_space<vmem>>, vector<1x16x1xf32>
    %150 = vector.shape_cast %149 : vector<1x16x1xf32> to vector<16x1xf32>
    %151 = vector.broadcast %150 : vector<16x1xf32> to vector<16x512xf32>
    %152 = arith.addf %148, %151 : vector<16x512xf32>
    %cst_83 = arith.constant 0.000000e+00 : f32
    %153 = vector.broadcast %cst_83 : f32 to vector<16x512xf32>
    %154 = arith.maximumf %152, %153 : vector<16x512xf32>
    %c0_84 = arith.constant 0 : index
    %c0_85 = arith.constant 0 : index
    %155 = vector.load %arg8[%c0_84, %c0_85] : memref<16x1xf32, #tpu.memory_space<vmem>>, vector<16x1xf32>
    %156 = vector.broadcast %155 : vector<16x1xf32> to vector<16x512xf32>
    %157 = arith.mulf %154, %156 : vector<16x512xf32>
    %cst_86 = arith.constant dense<0.000000e+00> : vector<512xf32>
    %158 = vector.multi_reduction <add>, %157, %cst_86 [0] : vector<16x512xf32> to vector<512xf32>
    %159 = vector.shape_cast %158 : vector<512xf32> to vector<1x512xf32>
    %c0_87 = arith.constant 0 : index
    %160 = memref.load %arg9[%c0_87] : memref<1xf32, #tpu.memory_space<smem>>
    %161 = vector.broadcast %160 : f32 to vector<1x512xf32>
    %162 = arith.addf %159, %161 : vector<1x512xf32>
    %163 = arith.addf %162, %1 : vector<1x512xf32>
    %c0_88 = arith.constant 0 : index
    %c0_89 = arith.constant 0 : index
    %c0_90 = arith.constant 0 : index
    %164 = vector.load %arg10[%c0_88, %c0_89, %c0_90] : memref<1x1x512xf32, #tpu.memory_space<vmem>>, vector<1x1x512xf32>
    %165 = vector.shape_cast %164 : vector<1x1x512xf32> to vector<1x512xf32>
    %166 = vector.shape_cast %163 : vector<1x512xf32> to vector<1x1x512xf32>
    tpu.vector_store %arg10[%c0_88, %c0_89, %c0_90], %166 {strides = array<i32>} : memref<1x1x512xf32, #tpu.memory_space<vmem>>, vector<1x1x512xf32>,
    return
  }
  func.func @transform_0(%arg0: i32) -> (i32, i32, i32) {
    %c0_i32 = arith.constant 0 : i32
    %c0_i32_0 = arith.constant 0 : i32
    %c0_i32_1 = arith.constant 0 : i32
    return %arg0, %c0_i32, %c0_i32_0 : i32, i32, i32
  }
  func.func @transform_1(%arg0: i32) -> (i32, i32, i32) {
    %c0_i32 = arith.constant 0 : i32
    %c0_i32_0 = arith.constant 0 : i32
    %c0_i32_1 = arith.constant 0 : i32
    return %arg0, %c0_i32, %c0_i32_0 : i32, i32, i32
  }
  func.func @transform_2(%arg0: i32) -> (i32, i32) {
    %c0_i32 = arith.constant 0 : i32
    %c0_i32_0 = arith.constant 0 : i32
    %c0_i32_1 = arith.constant 0 : i32
    return %c0_i32, %c0_i32_0 : i32, i32
  }
  func.func @transform_3(%arg0: i32) -> (i32, i32) {
    %c0_i32 = arith.constant 0 : i32
    %c0_i32_0 = arith.constant 0 : i32
    %c0_i32_1 = arith.constant 0 : i32
    return %c0_i32, %c0_i32_0 : i32, i32
  }
  func.func @transform_4(%arg0: i32) -> (i32, i32) {
    %c0_i32 = arith.constant 0 : i32
    %c0_i32_0 = arith.constant 0 : i32
    %c0_i32_1 = arith.constant 0 : i32
    return %c0_i32, %c0_i32_0 : i32, i32
  }
  func.func @transform_5(%arg0: i32) -> (i32, i32, i32) {
    %c0_i32 = arith.constant 0 : i32
    %c0_i32_0 = arith.constant 0 : i32
    %c0_i32_1 = arith.constant 0 : i32
    %c0_i32_2 = arith.constant 0 : i32
    return %c0_i32, %c0_i32_0, %c0_i32_1 : i32, i32, i32
  }
  func.func @transform_6(%arg0: i32) -> (i32, i32, i32) {
    %c0_i32 = arith.constant 0 : i32
    %c0_i32_0 = arith.constant 0 : i32
    %c0_i32_1 = arith.constant 0 : i32
    %c0_i32_2 = arith.constant 0 : i32
    return %c0_i32, %c0_i32_0, %c0_i32_1 : i32, i32, i32
  }
  func.func @transform_7(%arg0: i32) -> (i32, i32) {
    %c0_i32 = arith.constant 0 : i32
    %c0_i32_0 = arith.constant 0 : i32
    %c0_i32_1 = arith.constant 0 : i32
    return %c0_i32, %c0_i32_0 : i32, i32
  }
  func.func @transform_8(%arg0: i32) -> i32 {
    %c0_i32 = arith.constant 0 : i32
    %c0_i32_0 = arith.constant 0 : i32
    return %c0_i32 : i32
  }
  func.func @transform_9(%arg0: i32) -> (i32, i32, i32) {
    %c0_i32 = arith.constant 0 : i32
    %c0_i32_0 = arith.constant 0 : i32
    %c0_i32_1 = arith.constant 0 : i32
    return %arg0, %c0_i32, %c0_i32_0 : i32, i32, i32
  }
}

</mosaic_0001>

<bundles_post_ra>
// kernel: forward.1
= control target key start
LH: loop header
LB: loop body
LE: loop exit
PB: predicated region body
PF: predicated region fallthrough
CT: control target
= control target key end

     0   :  { %s2446_s11 = smov 0   ;;  %s3083_s0 = inlined_call_operand.vmem [shape: bf16[2,8,512], index: 0, kind: input, shape index: {}]   ;;  %s3084_s1 = inlined_call_operand.vmem [shape: f32[2,1,512], index: 1, kind: input, shape index: {}]   ;;  %s3085_s2 = inlined_call_operand.vmem [shape: bf16[9,512], index: 2, kind: input, shape index: {}]   ;;  %s3086_s3 = inlined_call_operand.vmem [shape: bf16[16,8], index: 3, kind: input, shape index: {}]   ;;  %s3087_s4 = inlined_call_operand.vmem [shape: f32[16,1], index: 4, kind: input, shape index: {}]   ;;  %s3088_s5 = inlined_call_operand.vmem [shape: bf16[2,16,144], index: 5, kind: input, shape index: {}]   ;;  %s3089_s6 = inlined_call_operand.vmem [shape: f32[2,16,1], index: 6, kind: input, shape index: {}]   ;;  %s3090_s7 = inlined_call_operand.vmem [shape: f32[16,1], index: 7, kind: input, shape index: {}]   ;;  %s3091_s8 = inlined_call_operand.<no memory space> [shape: f32[1], index: 8, kind: input, shape index: {}]   ;;  %s3092_s9 = inlined_call_operand.vmem [shape: f32[2,1,512], index: 9, kind: output, shape index: {}]  }
   0x1   :  { %14 = sst [smem:[#allocation3]] %s3091_s8 }
   0x2 LB: > { %s2179_s12 = sadd.s32 4294967295, %s2381_s11   ;;  %p2183_p0 = scmp.ge.s32.totalorder %s2381_s11, 1  ;;  %s2381_s11 = sphi %s2446_s11, %s20_s11  }
   0x3   : > { %p297_p1 = scmp.lt.s32.totalorder %s2381_s11, 3 }
   0x5   : > { %p298_p2 = pnand %p2183_p0, %p297_p1 }
   0x6   : > { %p336_p3 = scmp.lt.s32.totalorder (!%p298_p2), %s2179_s12, 1  ;;  %v2383_v0 = vmov (!%p298_p2), 0   ;;  %v429_v1 = vld [vmem:[%s3087_s4] sm:$0xff] (!%p298_p2)  ;;  %v430_v2 = vld [vmem:[%s3087_s4 + $0x8] sm:$0xff] (!%p298_p2)  ;;  %v359_v7 = vlaneseq (!%p298_p2)  ;;  %vm460_vm0 = vcmask (!%p298_p2), 1043456   ;;  %vm456_vm1 = vcmask (!%p298_p2), 64512  }
   0x7   : > { %301 = sbr.rel (%p298_p2) target bundleno = 1117 (0x45d), region = 56  ;;  %505 = vmatprep.mubr.bf16.mxu0 (!%p298_p2), %v2383_v0  ;;  %548 = vmatprep.mubr.bf16.mxu1 (!%p298_p2), %v2383_v0  ;;  %v2299_v43 = vld [vmem:[%s3086_s3] sm:$0xff] (!%p298_p2)   ;;  %s2384_s26 = smov (!%p298_p2), 127   ;;  %vm643_vm2 = vcmask (!%p298_p2), 130048   ;;  %vm575_vm3 = vcmask (!%p298_p2), 138240   ;;  %vm715_vm4 = vcmask (!%p298_p2), 121856  }
   0x8   : > { %2297 = vset.pattern.permute.xlu0 (!%p298_p2), %v2383_v0  ;;  %2298 = vset.pattern.permute.xlu1 (!%p298_p2), %v2383_v0  ;;  %v2472_v8 = vshrl.u32 (!%p298_p2), %v359_v7, 7  ;;  %s2385_s27 = smov (!%p298_p2), 17   ;;  %s2386_s28 = smov (!%p298_p2), 113   ;;  %vm783_vm5 = vcmask (!%p298_p2), 7168   ;;  %vm859_vm6 = vcmask (!%p298_p2), 1039360   ;;  %vm931_vm7 = vcmask (!%p298_p2), 924672  }
   0x9   : > { %433 = vperm.xlu0 (!%p298_p2), %2297, %v429_v1   ;;  %s2387_s29 = smov (!%p298_p2), 16   ;;  %s2388_s30 = smov (!%p298_p2), 15   ;;  %vm999_vm8 = vcmask (!%p298_p2), 916480   ;;  %vm1071_vm9 = vcmask (!%p298_p2), 908288   ;;  %vm2111_vm10 = vcmp.lt.s32.totalorder (!%p298_p2), %v359_v7, 512 }
   0xa   : > { %v2475_v9 = vsub.s32 (!%p298_p2), 0, %v2472_v8  ;;  %v2478_v10 = vsub.s32 (!%p298_p2), 1, %v2472_v8  ;;  %v2481_v11 = vsub.s32 (!%p298_p2), 2, %v2472_v8  ;;  %v2484_v12 = vsub.s32 (!%p298_p2), 3, %v2472_v8  ;;  %s2389_s10 = smov (!%p298_p2), 1   ;;  %s2390_s8 = smov (!%p298_p2), 112  }
   0xb   : > { %s2391_s13 = smov (!%p298_p2), 111   ;;  %s2049_s16 = sld [smem:[#allocation3]] (!%p298_p2) }
   0xd   : > { %438 = vperm.xlu0 (!%p298_p2), %2297, %v430_v2   ;;  %v2332_v2 = vld [vmem:[%s3088_s5 + $0x4] ss:$8 sps:$4 sm:$0xff] (!%p298_p2)  }
   0xe   : > { %s3094_s12 = smov (!%p336_p3, %s2179_s12), 1 }
   0xf   : > { %s2186_s14 = sshll.u32 %s3094_s12, 2  ;;  %s2278_s20 = sshll.u32 %s3094_s12, 4 }
  0x10   : > { %s2468_s19 = scalar_lea.vmem %s3084_s1, %s2186_s14  ;;  %s340_s23 = scalar_lea.vmem %s3083_s0, %s2278_s20 }
  0x11   : > { %v350_v3 = vld [vmem:[%s2468_s19] sm:$0xf]  ;;  %v384_v32 = vld [vmem:[%s340_s23 + $0x8] sm:$0xff] }
  0x12   : > { %v2188_v4 = vmul.f32 -1.442695, %v350_v3  ;;  %v383_v31 = vld [vmem:[%s340_s23] sm:$0xff] }
  0x13   : > { %v1169_v3 = vld [vmem:[%s3089_s6] sm:$0xff] }
  0x14   : > { %2370 = vpow2.f32 %v2188_v4  ;;  %v1170_v4 = vld [vmem:[%s3089_s6 + $0x8] sm:$0xff] }
  0x1e   : > { %v2371_v5 = vpop.eup %2370 }
  0x1f   : > { %v354_v6 = vadd.f32 1.0, %v2371_v5  ;;  %v587_v5 = vld [vmem:[%s3085_s2] sm:$0x11] }
  0x21   : > { %2372 = vrcp.f32 %v354_v6 }
  0x2b   : > { %v2373_v13 = vpop.eup %2372 }
  0x2c   : > { %v357_v14 = vsub.f32 1.0, %v2373_v13 }
  0x2e   : > { %v362_v15 = vrot.slane %v357_v14, %v2475_v9  ;;  %v366_v16 = vrot.slane %v357_v14, %v2478_v10  ;;  %v370_v17 = vrot.slane %v357_v14, %v2481_v11  ;;  %v374_v18 = vrot.slane %v357_v14, %v2484_v12 }
  0x2f   : > { %v2201_v14 = vcombine.high %v587_v5, %v587_v5 }
  0x30   : > { %v379_v19 = vpack.c.bf16 %v362_v15, %v362_v15  ;;  %v380_v20 = vpack.c.bf16 %v366_v16, %v366_v16  ;;  %v381_v21 = vpack.c.bf16 %v370_v17, %v370_v17  ;;  %v382_v22 = vpack.c.bf16 %v374_v18, %v374_v18 }
  0x31   : > { %v607_v17 = vpack.i.b16 %v2201_v14, %v2201_v14 }
  0x32   : > { %v386_v23 = vpack.i.b16 %v379_v19, %v379_v19  ;;  %v393_v24 = vpack.i.b16 %v380_v20, %v380_v20  ;;  %v400_v25 = vpack.i.b16 %v381_v21, %v381_v21  ;;  %v407_v26 = vpack.i.b16 %v382_v22, %v382_v22  ;;  %v655_v21 = vld [vmem:[%s3085_s2] sm:$0x11] }
  0x33   : > { %v612_v20 = vrot.slane %v607_v17, %v2475_v9 }
  0x34   : > { %v391_v27 = vrot.slane %v386_v23, %v2475_v9  ;;  %v398_v28 = vrot.slane %v393_v24, %v2475_v9  ;;  %v405_v29 = vrot.slane %v400_v25, %v2475_v9  ;;  %v412_v30 = vrot.slane %v407_v26, %v2475_v9  ;;  %v656_v25 = vld [vmem:[%s3085_s2 + $0x8] sm:$0x11] }
  0x35   : > { %v588_v26 = vld [vmem:[%s3085_s2 + $0x8] sm:$0x11] }
  0x36   : > { %v2189_v33 = vcombine.low %v391_v27, %v398_v28  ;;  %v2190_v34 = vcombine.low %v405_v29, %v412_v30  ;;  %v2204_v28 = vcombine.low %v655_v21, %v655_v21  ;;  %v2207_v29 = vcombine.high %v656_v25, %v656_v25 }
  0x38   : > { %v425_v35 = vmul.bf16 %v2189_v33, %v383_v31  ;;  %v426_v36 = vmul.bf16 %v2190_v34, %v384_v32  ;;  %v2202_v32 = vcombine.low %v588_v26, %v588_v26  ;;  %v2205_v33 = vcombine.high %v655_v21, %v655_v21 }
  0x39   : > { %v2206_v34 = vcombine.low %v656_v25, %v656_v25 }
  0x3a   : > { %v2193_v37 = vcombine.high %v425_v35, %v425_v35  ;;  %v2195_v38 = vcombine.high %v426_v36, %v426_v36  ;;  %v2192_v39 = vcombine.low %v425_v35, %v425_v35  ;;  %v2194_v40 = vcombine.low %v426_v36, %v426_v36  ;;  %v795_v35 = vld [vmem:[%s3085_s2] sm:$0x22]  ;;  %v796_v36 = vld [vmem:[%s3085_s2 + $0x8] sm:$0x22] }
  0x3c   : > { %2196 = vmatprep.subr.msk.bf16.mxu0 %vm460_vm0, %v2193_v37  ;;  %2198 = vmatprep.subr.msk.bf16.mxu1 %vm460_vm0, %v2195_v38  ;;  %v462_v41 = vsel %vm460_vm0, %v2192_v39, 0  ;;  %v468_v42 = vsel %vm460_vm0, %v2194_v40, 0  ;;  %v668_v37 = vshrl.u32 %v2204_v28, 16  ;;  %v727_v38 = vld [vmem:[%s3085_s2] sm:$0x22]  ;;  %v692_v39 = vshrl.u32 %v2207_v29, 16 }
  0x3d   : > { %474 = vmatpush1.bf16.msra.mxu0 %v462_v41  ;;  %517 = vmatpush1.bf16.msra.mxu1 %v468_v42  ;;  %v728_v42 = vld [vmem:[%s3085_s2 + $0x8] sm:$0x22] }
  0x40   : > { %2197 = vmatmul.mubr.msk.bf16.vlgmr.msra.gmra.mrb[0].mxu0 %vm456_vm1, %v2299_v43  ;;  %2199 = vmatmul.mubr.msk.bf16.vlgmr.msra.gmra.mrb[0].mxu1 %vm456_vm1, %v2299_v43  ;;  %v2212_v43 = vcombine.low %v795_v35, %v795_v35 }
  0x41   : > { %2234 = vmatprep.mubr.msk.bf16.mxu0 %vm643_vm2, %v2332_v2  ;;  %2235 = vmatprep.mubr.msk.bf16.mxu1 %vm643_vm2, %v2332_v2 }
  0x88   : > { %v434_v44 = vpop.permute.xlu0 %433 }
  0x8c   : > { %v439_v45 = vpop.permute.xlu0 %438 }
 0x113   : > { %v507_v46 = vpop.f32.mrb[0].mxu0  ;;  %v550_v47 = vpop.f32.mrb[0].mxu1 }
 0x114   : > { %v509_v48 = vpop.f32.mrb[1].mxu0  ;;  %v552_v49 = vpop.f32.mrb[1].mxu1  ;;  %v508_v52 = vadd.f32 %v507_v46, %v434_v44  ;;  %v551_v53 = vadd.f32 %v550_v47, %v434_v44  ;;  %v676_v46 = vshrl.u32 %v2205_v33, 16  ;;  %v684_v47 = vshrl.u32 %v2206_v34, 16 }
 0x115   : > { %v511_v50 = vpop.f32.mrb[2].mxu0  ;;  %v554_v51 = vpop.f32.mrb[2].mxu1  ;;  %v510_v58 = vadd.f32 %v509_v48, %v434_v44  ;;  %v553_v59 = vadd.f32 %v552_v49, %v434_v44  ;;  %v2215_v44 = vcombine.high %v796_v36, %v796_v36  ;;  %v669_v48 = vpack.i.b16 %v668_v37, %v668_v37 }
 0x116   : > { %v512_v54 = vadd.f32 %v511_v50, %v439_v45  ;;  %v555_v55 = vadd.f32 %v554_v51, %v439_v45  ;;  %v513_v56 = vpop.f32.mrb[3].mxu0  ;;  %v556_v57 = vpop.f32.mrb[3].mxu1  ;;  %v2208_v49 = vcombine.low %v727_v38, %v727_v38  ;;  %v2200_v50 = vcombine.low %v587_v5, %v587_v5 }
 0x117   : > { %v514_v60 = vadd.f32 %v513_v56, %v439_v45  ;;  %v557_v61 = vadd.f32 %v556_v57, %v439_v45  ;;  %v614_v45 = vpack.i.b16 %v2202_v32, %v2202_v32  ;;  %v2203_v51 = vcombine.high %v588_v26, %v588_v26 }
 0x118   : > { %v2501_v62 = vpack.c.bf16 %v512_v54, %v508_v52  ;;  %v2503_v63 = vpack.c.bf16 %v555_v55, %v551_v53  ;;  %v2211_v52 = vcombine.high %v728_v42, %v728_v42  ;;  %v2209_v53 = vcombine.high %v727_v38, %v727_v38 }
 0x119   : > { %v2505_v0 = vpack.c.bf16 %v514_v60, %v510_v58  ;;  %v2507_v1 = vpack.c.bf16 %v557_v61, %v553_v59  ;;  %v2210_v54 = vcombine.low %v728_v42, %v728_v42  ;;  %v693_v55 = vpack.i.b16 %v692_v39, %v692_v39 }
 0x11a   : > { %851 = vrot.lane.b32.xlu0 %v2501_v62, %s2384_s26  ;;  %569 = vrot.lane.b32.xlu1 %v2501_v62, %s2385_s27  ;;  %v808_v58 = vshrl.u32 %v2212_v43, 16  ;;  %v832_v59 = vshrl.u32 %v2215_v44, 16  ;;  %v2641_v60 = vrot.slane %v614_v45, %v2475_v9  ;;  %v677_v61 = vpack.i.b16 %v676_v46, %v676_v46 }
 0x11b   : > { %v685_v2 = vpack.i.b16 %v684_v47, %v684_v47  ;;  %v2647_v5 = vrot.slane %v669_v48, %v2475_v9  ;;  %v740_v14 = vpack.i.b16 %v2208_v49, %v2208_v49  ;;  %v600_v17 = vpack.i.b16 %v2200_v50, %v2200_v50 }
 0x11c   : > { %v761_v21 = vpack.i.b16 %v2211_v52, %v2211_v52  ;;  %v754_v25 = vpack.i.b16 %v2210_v54, %v2210_v54  ;;  %v2214_v26 = vcombine.low %v796_v36, %v796_v36  ;;  %v809_v32 = vpack.i.b16 %v808_v58, %v808_v58  ;;  %v872_v54 = vld [vmem:[%s3085_s2 + $0x8] sm:$0x44] }
 0x11d   : > { %v833_v33 = vpack.i.b16 %v832_v59, %v832_v59  ;;  %v2656_v37 = vrot.slane %v685_v2, %v2475_v9  ;;  %v2659_v39 = vrot.slane %v740_v14, %v2478_v10  ;;  %v605_v36 = vrot.slane %v600_v17, %v2475_v9 }
 0x11e   : > { %855 = vrot.lane.b32.xlu0 %v2503_v63, %s2384_s26  ;;  %573 = vrot.lane.b32.xlu1 %v2503_v63, %s2385_s27  ;;  %v2664_v44 = vrot.slane %v761_v21, %v2478_v10  ;;  %v2668_v46 = vrot.slane %v754_v25, %v2478_v10  ;;  %v824_v47 = vshrl.u32 %v2214_v26, 16  ;;  %v2674_v49 = vrot.slane %v809_v32, %v2478_v10 }
 0x11f   : > { %v2677_v50 = vrot.slane %v833_v33, %v2478_v10  ;;  %v2218_v21 = vcombine.low %v872_v54, %v872_v54  ;;  %v2219_v26 = vcombine.high %v872_v54, %v872_v54  ;;  %v943_v33 = vld [vmem:[%s3085_s2] sm:$0x88] }
 0x120   : > { %v2221_v54 = vcombine.high %v943_v33, %v943_v33 }
 0x122   : > { %923 = vrot.lane.b32.xlu0 %v2501_v62, %s2386_s28  ;;  %637 = vrot.lane.b32.xlu1 %v2501_v62, %s2387_s29 }
 0x126   : > { %571 = vrot.lane.b32.xlu0 %v2505_v0, %s2385_s27  ;;  %641 = vrot.lane.b32.xlu1 %v2503_v63, %s2387_s29 }
 0x12a   : > { %635 = vrot.lane.b32.xlu0 %v2507_v1, %s2387_s29  ;;  %709 = vrot.lane.b32.xlu1 %v2501_v62, %s2388_s30 }
 0x12e   : > { %639 = vrot.lane.b32.xlu0 %v2505_v0, %s2387_s29  ;;  %713 = vrot.lane.b32.xlu1 %v2503_v63, %s2388_s30 }
 0x132   : > { %707 = vrot.lane.b32.xlu0 %v2507_v1, %s2388_s30  ;;  %777 = vrot.lane.b32.xlu1 %v2501_v62, %s2389_s10 }
 0x136   : > { %711 = vrot.lane.b32.xlu0 %v2505_v0, %s2388_s30  ;;  %781 = vrot.lane.b32.xlu1 %v2503_v63, %s2389_s10 }
 0x13a   : > { %775 = vrot.lane.b32.xlu0 %v2507_v1, %s2389_s10  ;;  %564 = vrot.lane.b32.xlu1 %v2507_v1, %s2385_s27 }
 0x13e   : > { %779 = vrot.lane.b32.xlu0 %v2505_v0, %s2389_s10  ;;  %853 = vrot.lane.b32.xlu1 %v2505_v0, %s2384_s26 }
 0x142   : > { %927 = vrot.lane.b32.xlu0 %v2503_v63, %s2386_s28  ;;  %857 = vrot.lane.b32.xlu1 %v2507_v1, %s2384_s26 }
 0x146   : > { %991 = vrot.lane.b32.xlu0 %v2501_v62, %s2390_s8  ;;  %925 = vrot.lane.b32.xlu1 %v2505_v0, %s2386_s28 }
 0x14a   : > { %995 = vrot.lane.b32.xlu0 %v2503_v63, %s2390_s8  ;;  %929 = vrot.lane.b32.xlu1 %v2507_v1, %s2386_s28 }
 0x14e   : > { %1063 = vrot.lane.b32.xlu0 %v2501_v62, %s2391_s13  ;;  %993 = vrot.lane.b32.xlu1 %v2505_v0, %s2390_s8 }
 0x152   : > { %1067 = vrot.lane.b32.xlu0 %v2503_v63, %s2391_s13  ;;  %997 = vrot.lane.b32.xlu1 %v2507_v1, %s2390_s8 }
 0x156   : > { %1173 = vperm.xlu0 %2297, %v1169_v3   ;;  %1065 = vrot.lane.b32.xlu1 %v2505_v0, %s2391_s13  ;;  %v2213_v3 = vcombine.high %v795_v35, %v795_v35  ;;  %v682_v35 = vrot.slane %v677_v61, %v2475_v9 }
 0x158   : > { %v816_v38 = vshrl.u32 %v2213_v3, 16 }
 0x15a   : > { %1069 = vrot.lane.b32.xlu1 %v2507_v1, %s2391_s13  ;;  %v817_v61 = vpack.i.b16 %v816_v38, %v816_v38 }
 0x15e   : > { %1178 = vperm.xlu1 %2298, %v1170_v4   ;;  %v871_v4 = vld [vmem:[%s3085_s2] sm:$0x44] }
 0x15f   : > { %v2216_v34 = vcombine.low %v871_v4, %v871_v4  ;;  %v2217_v43 = vcombine.high %v871_v4, %v871_v4 }
 0x161   : > { %v2694_v14 = vshrl.u32 %v2217_v43, 16 }
 0x18c   : > { %v2587_v6 = vpop.permute.xlu0 %851  ;;  %v2589_v13 = vpop.permute.xlu1 %569 }
 0x190   : > { %v2591_v15 = vpop.permute.xlu0 %855  ;;  %v2593_v16 = vpop.permute.xlu1 %573 }
 0x194   : > { %v2595_v18 = vpop.permute.xlu0 %923  ;;  %v2597_v19 = vpop.permute.xlu1 %637 }
 0x198   : > { %v2603_v22 = vpop.permute.xlu0 %571  ;;  %v2605_v23 = vpop.permute.xlu1 %641 }
 0x199   : > { %v576_v24 = vsel %vm575_vm3, %v2589_v13, %v2603_v22 }
 0x19a   : > { %v628_v27 = vmul.bf16 %v612_v20, %v576_v24  ;;  %v621_v20 = vpack.i.b16 %v2203_v51, %v2203_v51  ;;  %v747_v24 = vpack.i.b16 %v2209_v53, %v2209_v53  ;;  %v2679_v53 = vshrl.u32 %v2216_v34, 16 }
 0x19c   : > { %v2616_v30 = vpop.permute.xlu0 %635  ;;  %1193 = vmatprep.subr.bf16.mxu0 %v628_v27  ;;  %v2618_v31 = vpop.permute.xlu1 %709  ;;  %v698_v27 = vrot.slane %v693_v55, %v2475_v9  ;;  %v626_v42 = vrot.slane %v621_v20, %v2475_v9  ;;  %v752_v45 = vrot.slane %v747_v24, %v2478_v10  ;;  %v577_v55 = vsel %vm575_vm3, %v2603_v22, %v2593_v16 }
 0x19d   : > { %v646_v2 = vsel %vm643_vm2, %v2605_v23, %v2616_v30  ;;  %v653_v17 = vsel %vm643_vm2, %v2616_v30, %v2597_v19  ;;  %v825_v20 = vpack.i.b16 %v824_v47, %v824_v47  ;;  %v822_v30 = vrot.slane %v817_v61, %v2478_v10 }
 0x19e   : > { %v702_v32 = vmul.bf16 %v698_v27, %v646_v2  ;;  %v699_v34 = vmul.bf16 %v2647_v5, %v653_v17 }
 0x19f   : > { %v2727_v5 = vrot.slane %v825_v20, %v2478_v10 }
 0x1a0   : > { %v2629_v40 = vpop.permute.xlu0 %639  ;;  %v2631_v41 = vpop.permute.xlu1 %713 }
 0x1a1   : > { %v644_v48 = vsel %vm643_vm2, %v2597_v19, %v2629_v40  ;;  %v645_v19 = vsel %vm643_vm2, %v2629_v40, %v2605_v23  ;;  %v893_v23 = vpack.i.b16 %v2694_v14, %v2694_v14  ;;  %v1011_v40 = vld [vmem:[%s3085_s2] sm:$0x88] }
 0x1a2   : > { %v700_v22 = vmul.bf16 %v682_v35, %v644_v48  ;;  %v701_v43 = vmul.bf16 %v2656_v37, %v645_v19  ;;  %v1012_v37 = vld [vmem:[%s3085_s2 + $0x8] sm:$0x88]  ;;  %v1083_v19 = vld [vmem:[%s3085_s2 + $0x10] sm:$0x11] }
 0x1a3   : > { %v2227_v20 = vcombine.high %v1012_v37, %v1012_v37 }
 0x1a4   : > { %v2636_v56 = vpop.permute.xlu0 %707  ;;  %v2638_v57 = vpop.permute.xlu1 %777 }
 0x1a5   : > { %v718_v27 = vsel %vm715_vm4, %v2631_v41, %v2636_v56  ;;  %v725_v35 = vsel %vm715_vm4, %v2636_v56, %v2618_v31  ;;  %v2220_v56 = vcombine.low %v943_v33, %v943_v33 }
 0x1a8   : > { %v2650_v28 = vpop.permute.xlu0 %711  ;;  %v2652_v29 = vpop.permute.xlu1 %781 }
 0x1ac   : > { %v776_v51 = vpop.permute.xlu0 %775  ;;  %v565_v52 = vpop.permute.xlu1 %564 }
 0x1ad   : > { %v578_v58 = vsel %vm575_vm3, %v2593_v16, %v565_v52  ;;  %v585_v59 = vsel %vm575_vm3, %v565_v52, %v2589_v13  ;;  %v629_v16 = vmul.bf16 %v2641_v60, %v577_v55  ;;  %v716_v13 = vsel %vm715_vm4, %v2618_v31, %v2650_v28 }
 0x1ae   : > { %v627_v3 = vmul.bf16 %v605_v36, %v585_v59  ;;  %v630_v4 = vmul.bf16 %v626_v42, %v578_v58  ;;  %v885_v60 = vpack.i.b16 %v2679_v53, %v2679_v53  ;;  %v768_v38 = vmul.bf16 %v752_v45, %v716_v13  ;;  %v944_v42 = vld [vmem:[%s3085_s2 + $0x8] sm:$0x88] }
 0x1af   : > { %v900_v36 = vshrl.u32 %v2218_v21, 16  ;;  %v908_v52 = vshrl.u32 %v2219_v26, 16  ;;  %v770_v45 = vmul.bf16 %v2664_v44, %v718_v27  ;;  %v717_v53 = vsel %vm715_vm4, %v2650_v28, %v2631_v41 }
 0x1b0   : > { %v780_v24 = vpop.permute.xlu0 %779  ;;  %1194 = vmatpush1.bf16.msra.mxu0 %v627_v3  ;;  %1236 = vmatprep.subr.bf16.mxu1 %v630_v4  ;;  %v2703_v25 = vpop.permute.xlu1 %853  ;;  %v2224_v55 = vcombine.low %v1011_v40, %v1011_v40  ;;  %v767_v58 = vmul.bf16 %v2659_v39, %v725_v35  ;;  %v786_v59 = vsel %vm783_vm5, %v2652_v29, %v776_v51 }
 0x1b1   : > { %1195 = vmatprep.subr.bf16.mxu0 %v700_v22  ;;  %1237 = vmatpush1.bf16.msra.mxu1 %v629_v16  ;;  %v784_v47 = vsel %vm783_vm5, %v2638_v57, %v780_v24  ;;  %v2222_v61 = vcombine.low %v944_v42, %v944_v42  ;;  %v2223_v2 = vcombine.high %v944_v42, %v944_v42 }
 0x1b2   : > { %1238 = vmatprep.subr.bf16.mxu1 %v702_v32  ;;  %v793_v44 = vsel %vm783_vm5, %v776_v51, %v2638_v57  ;;  %v840_v3 = vmul.bf16 %v822_v30, %v784_v47  ;;  %v901_v41 = vpack.i.b16 %v900_v36, %v900_v36  ;;  %v2225_v28 = vcombine.high %v1011_v40, %v1011_v40 }
 0x1b3   : > { %v769_v4 = vmul.bf16 %v2668_v46, %v717_v53  ;;  %v2753_v14 = vrot.slane %v885_v60, %v2481_v11  ;;  %v909_v17 = vpack.i.b16 %v908_v52, %v908_v52  ;;  %v842_v21 = vmul.bf16 %v2677_v50, %v786_v59 }
 0x1b4   : > { %v2735_v48 = vpop.permute.xlu0 %927  ;;  %1196 = vmatpush1.bf16.msra.mxu0 %v699_v34  ;;  %v2737_v31 = vpop.permute.xlu1 %857  ;;  %v785_v57 = vsel %vm783_vm5, %v780_v24, %v2652_v29  ;;  %v956_v51 = vpack.i.b16 %v2220_v56, %v2220_v56  ;;  %v1024_v16 = vshrl.u32 %v2224_v55, 16  ;;  %v839_v13 = vmul.bf16 %v2674_v49, %v793_v44 }
 0x1b5   : > { %1197 = vmatprep.subr.bf16.mxu0 %v768_v38  ;;  %1239 = vmatpush1.bf16.msra.mxu1 %v701_v43  ;;  %v963_v46 = vpack.i.b16 %v2221_v54, %v2221_v54  ;;  %v970_v26 = vpack.i.b16 %v2222_v61, %v2222_v61  ;;  %v977_v32 = vpack.i.b16 %v2223_v2, %v2223_v2  ;;  %v1032_v29 = vshrl.u32 %v2225_v28, 16 }
 0x1b6   : > { %1240 = vmatprep.subr.bf16.mxu1 %v770_v45  ;;  %v898_v30 = vrot.slane %v893_v23, %v2481_v11  ;;  %v2766_v50 = vrot.slane %v901_v41, %v2481_v11  ;;  %v2226_v24 = vcombine.low %v1012_v37, %v1012_v37  ;;  %v841_v60 = vmul.bf16 %v2727_v5, %v785_v57  ;;  %v1084_v45 = vld [vmem:[%s3085_s2 + $0x18] sm:$0x11] }
 0x1b7   : > { %v861_v49 = vsel %vm859_vm6, %v2703_v25, %v2591_v15  ;;  %v914_v33 = vrot.slane %v909_v17, %v2481_v11  ;;  %v1048_v40 = vshrl.u32 %v2227_v20, 16  ;;  %v961_v23 = vrot.slane %v956_v51, %v2484_v12 }
 0x1b8   : > { %v2755_v39 = vpop.permute.xlu0 %991  ;;  %1198 = vmatpush1.bf16.msra.mxu0 %v767_v58  ;;  %v926_v22 = vpop.permute.xlu1 %925  ;;  %v1025_v35 = vpack.i.b16 %v1024_v16, %v1024_v16  ;;  %v2229_v38 = vcombine.high %v1083_v19, %v1083_v19  ;;  %v869_v5 = vsel %vm859_vm6, %v2737_v31, %v2587_v6  ;;  %v968_v36 = vrot.slane %v963_v46, %v2484_v12 }
 0x1b9   : > { %1199 = vmatprep.subr.bf16.mxu0 %v840_v3  ;;  %1241 = vmatpush1.bf16.msra.mxu1 %v769_v4  ;;  %v975_v42 = vrot.slane %v970_v26, %v2484_v12  ;;  %v982_v43 = vrot.slane %v977_v32, %v2484_v12  ;;  %v860_v47 = vsel %vm859_vm6, %v2587_v6, %v2703_v25  ;;  %v1040_v56 = vshrl.u32 %v2226_v24, 16 }
 0x1ba   : > { %1242 = vmatprep.subr.bf16.mxu1 %v842_v21  ;;  %v916_v52 = vmul.bf16 %v898_v30, %v861_v49  ;;  %v933_v53 = vsel %vm931_vm7, %v926_v22, %v2735_v48  ;;  %v1049_v55 = vpack.i.b16 %v1048_v40, %v1048_v40  ;;  %v2228_v37 = vcombine.low %v1083_v19, %v1083_v19 }
 0x1bb   : > { %v862_v6 = vsel %vm859_vm6, %v2591_v15, %v2737_v31  ;;  %v1030_v25 = vrot.slane %v1025_v35, %v2484_v12  ;;  %v1103_v58 = vpack.i.b16 %v2229_v38, %v2229_v38  ;;  %v915_v59 = vmul.bf16 %v2753_v14, %v860_v47 }
 0x1bc   : > { %v2773_v34 = vpop.permute.xlu0 %995  ;;  %1200 = vmatpush1.bf16.msra.mxu0 %v839_v13  ;;  %v930_v27 = vpop.permute.xlu1 %929  ;;  %v2231_v44 = vcombine.high %v1084_v45, %v1084_v45  ;;  %v932_v3 = vsel %vm931_vm7, %v2595_v18, %v926_v22  ;;  %v984_v41 = vmul.bf16 %v968_v36, %v933_v53  ;;  %v1041_v31 = vpack.i.b16 %v1040_v56, %v1040_v56 }
 0x1bd   : > { %1201 = vmatprep.subr.bf16.mxu0 %v2505_v0  ;;  %1243 = vmatpush1.bf16.msra.mxu1 %v841_v60  ;;  %v1033_v0 = vpack.i.b16 %v1032_v29, %v1032_v29  ;;  %v941_v61 = vsel %vm931_vm7, %v930_v27, %v2595_v18  ;;  %v917_v28 = vmul.bf16 %v2766_v50, %v862_v6 }
 0x1be   : > { %1244 = vmatprep.subr.bf16.mxu1 %v2507_v1  ;;  %v918_v1 = vmul.bf16 %v914_v33, %v869_v5  ;;  %v1054_v14 = vrot.slane %v1049_v55, %v2484_v12  ;;  %v934_v20 = vsel %vm931_vm7, %v2735_v48, %v930_v27  ;;  %v986_v21 = vmul.bf16 %v982_v43, %v941_v61 }
 0x1bf   : > { %v1038_v15 = vrot.slane %v1033_v0, %v2484_v12  ;;  %v1108_v18 = vrot.slane %v1103_v58, %v2475_v9  ;;  %v983_v22 = vmul.bf16 %v961_v23, %v932_v3  ;;  %v1117_v16 = vpack.i.b16 %v2231_v44, %v2231_v44 }
 0x1c0   : > { %1202 = vmatpush1.bf16.msra.mxu0 %v2501_v62  ;;  %v994_v54 = vpop.permute.xlu1 %993  ;;  %v1064_v2 = vpop.permute.xlu0 %1063  ;;  %v2230_v62 = vcombine.low %v1084_v45, %v1084_v45  ;;  %v985_v26 = vmul.bf16 %v975_v42, %v934_v20  ;;  %v1046_v48 = vrot.slane %v1041_v31, %v2484_v12  ;;  %v2334_v42 = vld [vmem:[%s3088_s5] ss:$8 sps:$4 sm:$0xff]  }
 0x1c1   : > { %1203 = vmatprep.subr.bf16.mxu0 %v916_v52  ;;  %1245 = vmatpush1.bf16.msra.mxu1 %v2503_v63  ;;  %v1001_v4 = vsel %vm999_vm8, %v994_v54, %v2773_v34  ;;  %v1096_v63 = vpack.i.b16 %v2228_v37, %v2228_v37  ;;  %v1000_v13 = vsel %vm999_vm8, %v2755_v39, %v994_v54 }
 0x1c2   : > { %1246 = vmatprep.subr.bf16.mxu1 %v918_v1  ;;  %v1110_v51 = vpack.i.b16 %v2230_v62, %v2230_v62  ;;  %v1056_v46 = vmul.bf16 %v1038_v15, %v1001_v4  ;;  %v1055_v60 = vmul.bf16 %v1030_v25, %v1000_v13  ;;  %v1122_v33 = vrot.slane %v1117_v16, %v2475_v9  ;;  %v2002_v16 = vld [vmem:[%s3090_s7 + $0x8] sm:$0xff] }
 0x1c3   : > { %v1101_v29 = vrot.slane %v1096_v63, %v2475_v9  ;;  %v1314_v13 = vld [vmem:[%s3085_s2 + $0x8] sm:$0x11] }
 0x1c4   : > { %1204 = vmatpush1.bf16.msra.mxu0 %v915_v59  ;;  %v998_v17 = vpop.permute.xlu1 %997  ;;  %v1068_v32 = vpop.permute.xlu0 %1067 }
 0x1c5   : > { %1205 = vmatprep.subr.bf16.mxu0 %v984_v41  ;;  %v1009_v57 = vsel %vm999_vm8, %v998_v17, %v2755_v39  ;;  %1247 = vmatpush1.bf16.msra.mxu1 %v917_v28  ;;  %v1002_v30 = vsel %vm999_vm8, %v2773_v34, %v998_v17  ;;  %v1115_v39 = vrot.slane %v1110_v51, %v2475_v9  ;;  %v2001_v51 = vld [vmem:[%s3090_s7] sm:$0xff] }
 0x1c6   : > { %1248 = vmatprep.subr.bf16.mxu1 %v986_v21  ;;  %v1058_v50 = vmul.bf16 %v1054_v14, %v1009_v57  ;;  %v1057_v40 = vmul.bf16 %v1046_v48, %v1002_v30  ;;  %v2271_v57 = vld [vmem:[%s3089_s6 + $0x18] sm:$0xff]  ;;  %v1380_v48 = vld [vmem:[%s3085_s2 + $0x8] sm:$0x11] }
 0x1c8   : > { %1206 = vmatpush1.bf16.msra.mxu0 %v983_v22  ;;  %v1066_v19 = vpop.permute.xlu1 %1065  ;;  %v2270_v22 = vld [vmem:[%s3089_s6 + $0x10] sm:$0xff] }
 0x1c9   : > { %v1073_v24 = vsel %vm1071_vm9, %v1066_v19, %v1068_v32  ;;  %1207 = vmatprep.subr.bf16.mxu0 %v1056_v46  ;;  %1249 = vmatpush1.bf16.msra.mxu1 %v985_v26  ;;  %v1072_v27 = vsel %vm1071_vm9, %v1064_v2, %v1066_v19 }
 0x1ca   : > { %v1124_v49 = vmul.bf16 %v1108_v18, %v1073_v24  ;;  %1250 = vmatprep.subr.bf16.mxu1 %v1058_v50  ;;  %v1123_v38 = vmul.bf16 %v1101_v29, %v1072_v27  ;;  %v2367_v18 = vld [vmem:[%s3088_s5 + $0x14] ss:$8 sps:$4 sm:$0xff]   ;;  %v1313_v50 = vld [vmem:[%s3085_s2] sm:$0x11]  ;;  %v2243_v24 = vcombine.high %v1380_v48, %v1380_v48 }
 0x1cb   : > { %v2237_v29 = vcombine.high %v1313_v50, %v1313_v50 }
 0x1cc   : > { %1208 = vmatpush1.bf16.msra.mxu0 %v1055_v60  ;;  %v1070_v23 = vpop.permute.xlu1 %1069 }
 0x1cd   : > { %v1074_v34 = vsel %vm1071_vm9, %v1068_v32, %v1070_v23  ;;  %v1081_v35 = vsel %vm1071_vm9, %v1070_v23, %v1064_v2  ;;  %1209 = vmatprep.subr.bf16.mxu0 %v1124_v49  ;;  %1251 = vmatpush1.bf16.msra.mxu1 %v1057_v40  ;;  %v2239_v32 = vcombine.high %v1314_v13, %v1314_v13  ;;  %v1379_v40 = vld [vmem:[%s3085_s2] sm:$0x11] }
 0x1ce   : > { %v1125_v5 = vmul.bf16 %v1115_v39, %v1074_v34  ;;  %v1126_v36 = vmul.bf16 %v1122_v33, %v1081_v35  ;;  %v2238_v49 = vcombine.low %v1314_v13, %v1314_v13  ;;  %v2236_v39 = vcombine.low %v1313_v50, %v1313_v50 }
 0x1cf   : > { %v1347_v60 = vpack.i.b16 %v2239_v32, %v2239_v32  ;;  %v1333_v23 = vpack.i.b16 %v2237_v29, %v2237_v29  ;;  %v1416_v34 = vshrl.u32 %v2243_v24, 16 }
 0x1d0   : > { %1210 = vmatpush1.bf16.msra.mxu0 %v1123_v38  ;;  %1252 = vmatprep.subr.bf16.mxu1 %v1126_v36  ;;  %v1340_v38 = vpack.i.b16 %v2238_v49, %v2238_v49  ;;  %v2242_v36 = vcombine.low %v1380_v48, %v1380_v48 }
 0x1d1   : > { %1253 = vmatpush1.bf16.msra.mxu1 %v1125_v5  ;;  %v1352_v35 = vrot.slane %v1347_v60, %v2475_v9  ;;  %v2241_v5 = vcombine.high %v1379_v40, %v1379_v40 }
 0x1d3   : > { %1226 = vmatmul.mubr.bf16.vlgmr.msra.gmra.mrb[4].mxu0 %v2334_v42 }
 0x1d4   : > { %1269 = vmatmul.mubr.bf16.vlgmr.msra.gmra.mrb[4].mxu1 %v2334_v42  ;;  %2274 = vmatprep.mubr.msk.bf16.mxu0 %vm643_vm2, %v2367_v18  ;;  %v1326_v42 = vpack.i.b16 %v2236_v39, %v2236_v39 }
 0x1d5   : > { %v1174_v43 = vpop.permute.xlu0 %1173  ;;  %2275 = vmatprep.mubr.msk.bf16.mxu1 %vm643_vm2, %v2367_v18  ;;  %v1449_v18 = vld [vmem:[%s3085_s2] sm:$0x22] }
 0x1d6   : > { %v2245_v13 = vcombine.high %v1449_v18, %v1449_v18  ;;  %v2244_v60 = vcombine.low %v1449_v18, %v1449_v18 }
 0x1dd   : > { %v1179_v52 = vpop.permute.xlu1 %1178 }
 0x2a6   : > { %v1227_v47 = vpop.f32.mrb[4].mxu0 }
 0x2a7   : > { %v1228_v0 = vadd.f32 %v1227_v47, %v1174_v43  ;;  %v1229_v56 = vpop.f32.mrb[5].mxu0  ;;  %v1270_v53 = vpop.f32.mrb[4].mxu1 }
 0x2a8   : > { %v1230_v45 = vadd.f32 %v1229_v56, %v1174_v43  ;;  %v1231_v54 = vpop.f32.mrb[6].mxu0  ;;  %v1271_v55 = vadd.f32 %v1270_v53, %v1174_v43  ;;  %v1272_v37 = vpop.f32.mrb[5].mxu1  ;;  %v1338_v56 = vrot.slane %v1333_v23, %v2475_v9  ;;  %v1450_v53 = vld [vmem:[%s3085_s2 + $0x8] sm:$0x22] }
 0x2a9   : > { %v1232_v6 = vadd.f32 %v1231_v54, %v1179_v52  ;;  %v1233_v1 = vpop.f32.mrb[7].mxu0  ;;  %v1273_v25 = vadd.f32 %v1272_v37, %v1174_v43  ;;  %v1274_v59 = vpop.f32.mrb[6].mxu1  ;;  %v1279_v61 = vmax.f32 %v1228_v0, 0.0  ;;  %v2240_v43 = vcombine.low %v1379_v40, %v1379_v40 }
 0x2aa   : > { %v1234_v58 = vadd.f32 %v1233_v1, %v1179_v52  ;;  %v1275_v62 = vadd.f32 %v1274_v59, %v1179_v52  ;;  %v1276_v44 = vpop.f32.mrb[7].mxu1  ;;  %v1280_v3 = vmax.f32 %v1230_v45, 0.0  ;;  %v1281_v31 = vmax.f32 %v1271_v55, 0.0 }
 0x2ab   : > { %v1283_v2 = vmax.f32 %v1232_v6, 0.0  ;;  %v1277_v15 = vadd.f32 %v1276_v44, %v1179_v52  ;;  %v1282_v14 = vmax.f32 %v1273_v25, 0.0  ;;  %v1417_v45 = vpack.i.b16 %v1416_v34, %v1416_v34 }
 0x2ac   : > { %v1284_v41 = vmax.f32 %v1234_v58, 0.0  ;;  %v1285_v4 = vmax.f32 %v1275_v62, 0.0  ;;  %v1345_v55 = vrot.slane %v1340_v38, %v2475_v9  ;;  %v1400_v37 = vshrl.u32 %v2241_v5, 16 }
 0x2ad   : > { %v2828_v28 = vpack.c.bf16 %v1283_v2, %v1279_v61  ;;  %v1286_v63 = vmax.f32 %v1277_v15, 0.0  ;;  %v1408_v6 = vshrl.u32 %v2242_v36, 16  ;;  %v1331_v1 = vrot.slane %v1326_v42, %v2475_v9  ;;  %v1589_v42 = vld [vmem:[%s3085_s2] sm:$0x44] }
 0x2ae   : > { %v2830_v17 = vpack.c.bf16 %v1284_v41, %v1280_v3  ;;  %v2832_v20 = vpack.c.bf16 %v1285_v4, %v1281_v31  ;;  %v1392_v25 = vshrl.u32 %v2240_v43, 16  ;;  %v2247_v2 = vcombine.high %v1450_v53, %v1450_v53 }
 0x2af   : > { %1571 = vrot.lane.b32.xlu0 %v2828_v28, %s2384_s26  ;;  %1297 = vrot.lane.b32.xlu1 %v2828_v28, %s2385_s27  ;;  %v2838_v21 = vpack.c.bf16 %v1286_v63, %v1282_v14  ;;  %v1422_v3 = vrot.slane %v1417_v45, %v2475_v9  ;;  %v1401_v31 = vpack.i.b16 %v1400_v37, %v1400_v37 }
 0x2b0   : > { %v1409_v4 = vpack.i.b16 %v1408_v6, %v1408_v6  ;;  %v1393_v63 = vpack.i.b16 %v1392_v25, %v1392_v25  ;;  %v2246_v32 = vcombine.low %v1450_v53, %v1450_v53  ;;  %v1469_v34 = vpack.i.b16 %v2245_v13, %v2245_v13 }
 0x2b2   : > { %v1414_v50 = vrot.slane %v1409_v4, %v2475_v9  ;;  %v1398_v24 = vrot.slane %v1393_v63, %v2475_v9  ;;  %v1476_v36 = vpack.i.b16 %v2246_v32, %v2246_v32  ;;  %v1474_v25 = vrot.slane %v1469_v34, %v2478_v10  ;;  %v1659_v32 = vld [vmem:[%s3085_s2] sm:$0x88] }
 0x2b3   : > { %1575 = vrot.lane.b32.xlu0 %v2832_v20, %s2384_s26  ;;  %1301 = vrot.lane.b32.xlu1 %v2832_v20, %s2385_s27 }
 0x2b7   : > { %1641 = vrot.lane.b32.xlu0 %v2828_v28, %s2386_s28  ;;  %1363 = vrot.lane.b32.xlu1 %v2828_v28, %s2387_s29 }
 0x2bb   : > { %1292 = vrot.lane.b32.xlu0 %v2838_v21, %s2385_s27  ;;  %1367 = vrot.lane.b32.xlu1 %v2832_v20, %s2387_s29 }
 0x2bf   : > { %1299 = vrot.lane.b32.xlu0 %v2830_v17, %s2385_s27  ;;  %1433 = vrot.lane.b32.xlu1 %v2828_v28, %s2388_s30 }
 0x2c3   : > { %1361 = vrot.lane.b32.xlu0 %v2838_v21, %s2387_s29  ;;  %1437 = vrot.lane.b32.xlu1 %v2832_v20, %s2388_s30 }
 0x2c7   : > { %1365 = vrot.lane.b32.xlu0 %v2830_v17, %s2387_s29  ;;  %1499 = vrot.lane.b32.xlu1 %v2828_v28, %s2389_s10 }
 0x2cb   : > { %1431 = vrot.lane.b32.xlu0 %v2838_v21, %s2388_s30  ;;  %1503 = vrot.lane.b32.xlu1 %v2832_v20, %s2389_s10 }
 0x2cf   : > { %1435 = vrot.lane.b32.xlu0 %v2830_v17, %s2388_s30  ;;  %1573 = vrot.lane.b32.xlu1 %v2830_v17, %s2384_s26 }
 0x2d3   : > { %1497 = vrot.lane.b32.xlu0 %v2838_v21, %s2389_s10  ;;  %1577 = vrot.lane.b32.xlu1 %v2838_v21, %s2384_s26 }
 0x2d7   : > { %1501 = vrot.lane.b32.xlu0 %v2830_v17, %s2389_s10  ;;  %1643 = vrot.lane.b32.xlu1 %v2830_v17, %s2386_s28 }
 0x2db   : > { %1645 = vrot.lane.b32.xlu0 %v2832_v20, %s2386_s28  ;;  %1647 = vrot.lane.b32.xlu1 %v2838_v21, %s2386_s28 }
 0x2df   : > { %1707 = vrot.lane.b32.xlu0 %v2828_v28, %s2390_s8  ;;  %1709 = vrot.lane.b32.xlu1 %v2830_v17, %s2390_s8 }
 0x2e3   : > { %1711 = vrot.lane.b32.xlu0 %v2832_v20, %s2390_s8  ;;  %1713 = vrot.lane.b32.xlu1 %v2838_v21, %s2390_s8 }
 0x2e7   : > { %1777 = vrot.lane.b32.xlu0 %v2828_v28, %s2391_s13  ;;  %1779 = vrot.lane.b32.xlu1 %v2830_v17, %s2391_s13 }
 0x2eb   : > { %1781 = vrot.lane.b32.xlu0 %v2832_v20, %s2391_s13  ;;  %1783 = vrot.lane.b32.xlu1 %v2838_v21, %s2391_s13  ;;  %s348_s13 = scalar_lea.vmem %s3092_s9, %s2186_s14 }
 0x2ef   : > { %1887 = vperm.xlu0 %2297, %v2270_v22   ;;  %1892 = vperm.xlu1 %2298, %v2271_v57   ;;  %v1516_v22 = vld [vmem:[%s3085_s2 + $0x8] sm:$0x22] }
 0x2f0   : > { %v2251_v29 = vcombine.high %v1516_v22, %v1516_v22  ;;  %v2250_v45 = vcombine.low %v1516_v22, %v1516_v22 }
 0x2f3   : > { %2005 = vperm.xlu0 %2297, %v2001_v51   ;;  %2010 = vperm.xlu1 %2298, %v2002_v16   ;;  %v1483_v16 = vpack.i.b16 %v2247_v2, %v2247_v2 }
 0x2f5   : > { %v1488_v23 = vrot.slane %v1483_v16, %v2478_v10 }
 0x321   : > { %v2920_v46 = vpop.permute.xlu0 %1571  ;;  %v1298_v26 = vpop.permute.xlu1 %1297 }
 0x325   : > { %v2925_v19 = vpop.permute.xlu0 %1575  ;;  %v1302_v30 = vpop.permute.xlu1 %1301 }
 0x329   : > { %v2930_v33 = vpop.permute.xlu0 %1641  ;;  %v1364_v27 = vpop.permute.xlu1 %1363 }
 0x32d   : > { %v1293_v47 = vpop.permute.xlu0 %1292  ;;  %v1368_v52 = vpop.permute.xlu1 %1367 }
 0x32e   : > { %v1305_v0 = vsel %vm575_vm3, %v1302_v30, %v1293_v47  ;;  %v1311_v58 = vsel %vm575_vm3, %v1293_v47, %v1298_v26 }
 0x32f   : > { %v1356_v54 = vmul.bf16 %v1352_v35, %v1305_v0  ;;  %v1353_v14 = vmul.bf16 %v1331_v1, %v1311_v58  ;;  %v1515_v35 = vld [vmem:[%s3085_s2] sm:$0x22]  ;;  %v2253_v58 = vcombine.high %v1589_v42, %v1589_v42 }
 0x330   : > { %v2249_v43 = vcombine.high %v1515_v35, %v1515_v35 }
 0x331   : > { %v1300_v59 = vpop.permute.xlu0 %1299  ;;  %1950 = vmatprep.subr.bf16.mxu1 %v1356_v54  ;;  %v2944_v61 = vpop.permute.xlu1 %1433  ;;  %v1462_v54 = vpack.i.b16 %v2244_v60, %v2244_v60  ;;  %v1610_v13 = vshrl.u32 %v2253_v58, 16 }
 0x332   : > { %v1303_v62 = vsel %vm575_vm3, %v1298_v26, %v1300_v59  ;;  %v1304_v44 = vsel %vm575_vm3, %v1300_v59, %v1302_v30  ;;  %v1406_v30 = vrot.slane %v1401_v31, %v2475_v9  ;;  %v1536_v59 = vshrl.u32 %v2249_v43, 16 }
 0x333   : > { %v1354_v41 = vmul.bf16 %v1338_v56, %v1303_v62  ;;  %v1355_v15 = vmul.bf16 %v1345_v55, %v1304_v44  ;;  %v1552_v56 = vshrl.u32 %v2251_v29, 16  ;;  %v2248_v55 = vcombine.low %v1515_v35, %v1515_v35 }
 0x334   : > { %v1481_v62 = vrot.slane %v1476_v36, %v2478_v10  ;;  %v2257_v43 = vcombine.high %v1659_v32, %v1659_v32 }
 0x335   : > { %v1362_v57 = vpop.permute.xlu0 %1361  ;;  %1907 = vmatprep.subr.bf16.mxu0 %v1354_v41  ;;  %1951 = vmatpush1.bf16.msra.mxu1 %v1355_v15  ;;  %v1438_v51 = vpop.permute.xlu1 %1437  ;;  %v1553_v44 = vpack.i.b16 %v1552_v56, %v1552_v56  ;;  %v1467_v41 = vrot.slane %v1462_v54, %v2478_v10  ;;  %v1528_v15 = vshrl.u32 %v2248_v55, 16 }
 0x336   : > { %v1371_v26 = vsel %vm643_vm2, %v1368_v52, %v1362_v57  ;;  %1908 = vmatpush1.bf16.msra.mxu0 %v1353_v14  ;;  %v1377_v49 = vsel %vm643_vm2, %v1362_v57, %v1364_v27 }
 0x337   : > { %v1426_v48 = vmul.bf16 %v1422_v3, %v1371_v26  ;;  %v1423_v53 = vmul.bf16 %v1398_v24, %v1377_v49  ;;  %v1544_v3 = vshrl.u32 %v2250_v45, 16  ;;  %v1537_v26 = vpack.i.b16 %v1536_v59, %v1536_v59  ;;  %v1725_v45 = vld [vmem:[%s3085_s2] sm:$0x88] }
 0x338   : > { %v1529_v60 = vpack.i.b16 %v1528_v15, %v1528_v15 }
 0x339   : > { %v1366_v39 = vpop.permute.xlu0 %1365  ;;  %1952 = vmatprep.subr.bf16.mxu1 %v1426_v48  ;;  %v2960_v40 = vpop.permute.xlu1 %1499  ;;  %v1545_v29 = vpack.i.b16 %v1544_v3, %v1544_v3  ;;  %v1679_v3 = vpack.i.b16 %v2257_v43, %v2257_v43 }
 0x33a   : > { %v1369_v38 = vsel %vm643_vm2, %v1364_v27, %v1366_v39  ;;  %v1370_v5 = vsel %vm643_vm2, %v1366_v39, %v1368_v52  ;;  %v2252_v27 = vcombine.low %v1589_v42, %v1589_v42  ;;  %v1590_v52 = vld [vmem:[%s3085_s2 + $0x8] sm:$0x44]  ;;  %v1542_v42 = vrot.slane %v1537_v26, %v2478_v10 }
 0x33b   : > { %v1424_v47 = vmul.bf16 %v1406_v30, %v1369_v38  ;;  %v1425_v0 = vmul.bf16 %v1414_v50, %v1370_v5  ;;  %v2255_v31 = vcombine.high %v1590_v52, %v1590_v52  ;;  %v2254_v22 = vcombine.low %v1590_v52, %v1590_v52 }
 0x33c   : > { %v2982_v63 = vshrl.u32 %v2252_v27, 16  ;;  %v1558_v50 = vrot.slane %v1553_v44, %v2478_v10  ;;  %v2256_v38 = vcombine.low %v1659_v32, %v1659_v32  ;;  %v1611_v5 = vpack.i.b16 %v1610_v13, %v1610_v13 }
 0x33d   : > { %v1432_v37 = vpop.permute.xlu0 %1431  ;;  %1909 = vmatprep.subr.bf16.mxu0 %v1424_v47  ;;  %1953 = vmatpush1.bf16.msra.mxu1 %v1425_v0  ;;  %v2971_v6 = vpop.permute.xlu1 %1503  ;;  %v1626_v49 = vshrl.u32 %v2255_v31, 16  ;;  %v1618_v34 = vshrl.u32 %v2254_v22, 16  ;;  %v1550_v0 = vrot.slane %v1545_v29, %v2478_v10  ;;  %v1534_v54 = vrot.slane %v1529_v60, %v2478_v10 }
 0x33e   : > { %v1441_v1 = vsel %vm715_vm4, %v1438_v51, %v1432_v37  ;;  %1910 = vmatpush1.bf16.msra.mxu0 %v1423_v53  ;;  %v1447_v4 = vsel %vm715_vm4, %v1432_v37, %v2944_v61  ;;  %v1603_v39 = vpack.i.b16 %v2982_v63, %v2982_v63  ;;  %v2261_v27 = vcombine.high %v1725_v45, %v1725_v45 }
 0x33f   : > { %v1492_v2 = vmul.bf16 %v1488_v23, %v1441_v1  ;;  %v1489_v24 = vmul.bf16 %v1467_v41, %v1447_v4  ;;  %v1627_v55 = vpack.i.b16 %v1626_v49, %v1626_v49  ;;  %v1619_v1 = vpack.i.b16 %v1618_v34, %v1618_v34 }
 0x340   : > { %v1672_v58 = vpack.i.b16 %v2256_v38, %v2256_v38  ;;  %v2260_v41 = vcombine.low %v1725_v45, %v1725_v45  ;;  %v1616_v13 = vrot.slane %v1611_v5, %v2481_v11  ;;  %v1684_v60 = vrot.slane %v1679_v3, %v2484_v12 }
 0x341   : > { %v1436_v14 = vpop.permute.xlu0 %1435  ;;  %1954 = vmatprep.subr.bf16.mxu1 %v1492_v2  ;;  %v2984_v18 = vpop.permute.xlu1 %1573  ;;  %v1632_v22 = vrot.slane %v1627_v55, %v2481_v11 }
 0x342   : > { %v1439_v57 = vsel %vm715_vm4, %v2944_v61, %v1436_v14  ;;  %v1440_v16 = vsel %vm715_vm4, %v1436_v14, %v1438_v51  ;;  %v1660_v61 = vld [vmem:[%s3085_s2 + $0x8] sm:$0x88]  ;;  %v1738_v29 = vshrl.u32 %v2260_v41, 16  ;;  %v1579_v38 = vsel %vm859_vm6, %v2920_v46, %v2984_v18 }
 0x343   : > { %v1490_v48 = vmul.bf16 %v1474_v25, %v1439_v57  ;;  %v1491_v30 = vmul.bf16 %v1481_v62, %v1440_v16  ;;  %v1726_v51 = vld [vmem:[%s3085_s2 + $0x8] sm:$0x88]  ;;  %v2258_v56 = vcombine.low %v1660_v61, %v1660_v61  ;;  %v2259_v37 = vcombine.high %v1660_v61, %v1660_v61 }
 0x344   : > { %v2263_v53 = vcombine.high %v1726_v51, %v1726_v51  ;;  %v2262_v2 = vcombine.low %v1726_v51, %v1726_v51  ;;  %v1746_v16 = vshrl.u32 %v2261_v27, 16 }
 0x345   : > { %v1498_v23 = vpop.permute.xlu0 %1497  ;;  %1911 = vmatprep.subr.bf16.mxu0 %v1490_v48  ;;  %1955 = vmatpush1.bf16.msra.mxu1 %v1491_v30  ;;  %v1578_v35 = vpop.permute.xlu1 %1577  ;;  %v1686_v4 = vpack.i.b16 %v2258_v56, %v2258_v56  ;;  %v1693_v57 = vpack.i.b16 %v2259_v37, %v2259_v37  ;;  %v1608_v48 = vrot.slane %v1603_v39, %v2481_v11 }
 0x346   : > { %v1507_v36 = vsel %vm783_vm5, %v2971_v6, %v1498_v23  ;;  %1912 = vmatpush1.bf16.msra.mxu0 %v1489_v24  ;;  %v1513_v52 = vsel %vm783_vm5, %v1498_v23, %v2960_v40  ;;  %v1762_v14 = vshrl.u32 %v2263_v53, 16  ;;  %v1587_v26 = vsel %vm859_vm6, %v1578_v35, %v2920_v46 }
 0x347   : > { %v1562_v47 = vmul.bf16 %v1558_v50, %v1507_v36  ;;  %v1559_v63 = vmul.bf16 %v1534_v54, %v1513_v52  ;;  %v1754_v32 = vshrl.u32 %v2262_v2, 16  ;;  %v1580_v30 = vsel %vm859_vm6, %v2984_v18, %v2925_v19 }
 0x348   : > { %v1624_v50 = vrot.slane %v1619_v1, %v2481_v11  ;;  %v1677_v24 = vrot.slane %v1672_v58, %v2484_v12  ;;  %v1691_v49 = vrot.slane %v1686_v4, %v2484_v12  ;;  %v1763_v61 = vpack.i.b16 %v1762_v14, %v1762_v14 }
 0x349   : > { %v1502_v25 = vpop.permute.xlu0 %1501  ;;  %1956 = vmatprep.subr.bf16.mxu1 %v1562_v47  ;;  %v1644_v59 = vpop.permute.xlu1 %1643  ;;  %v1581_v51 = vsel %vm859_vm6, %v2925_v19, %v1578_v35  ;;  %v1636_v39 = vmul.bf16 %v1632_v22, %v1587_v26  ;;  %v1698_v23 = vrot.slane %v1693_v57, %v2484_v12  ;;  %v1747_v34 = vpack.i.b16 %v1746_v16, %v1746_v16 }
 0x34a   : > { %v1505_v62 = vsel %vm783_vm5, %v2960_v40, %v1502_v25  ;;  %v1506_v44 = vsel %vm783_vm5, %v1502_v25, %v2971_v6  ;;  %v1634_v5 = vmul.bf16 %v1616_v13, %v1580_v30  ;;  %v1755_v35 = vpack.i.b16 %v1754_v32, %v1754_v32 }
 0x34b   : > { %v1560_v15 = vmul.bf16 %v1542_v42, %v1505_v62  ;;  %v1561_v31 = vmul.bf16 %v1550_v0, %v1506_v44  ;;  %v1795_v42 = vld [vmem:[%s3085_s2 + $0x10] sm:$0x11]  ;;  %v1739_v47 = vpack.i.b16 %v1738_v29, %v1738_v29  ;;  %v1635_v18 = vmul.bf16 %v1624_v50, %v1581_v51 }
 0x34c   : > { %v2265_v46 = vcombine.high %v1795_v42, %v1795_v42  ;;  %v1768_v0 = vrot.slane %v1763_v61, %v2484_v12  ;;  %v2264_v55 = vcombine.low %v1795_v42, %v1795_v42  ;;  %v1649_v37 = vsel %vm931_vm7, %v2930_v33, %v1644_v59 }
 0x34d   : > { %v1646_v40 = vpop.permute.xlu0 %1645  ;;  %1913 = vmatprep.subr.bf16.mxu0 %v1560_v15  ;;  %1957 = vmatpush1.bf16.msra.mxu1 %v1561_v31  ;;  %v1648_v6 = vpop.permute.xlu1 %1647  ;;  %v1752_v52 = vrot.slane %v1747_v34, %v2484_v12  ;;  %v1760_v1 = vrot.slane %v1755_v35, %v2484_v12  ;;  %v1744_v15 = vrot.slane %v1739_v47, %v2484_v12 }
 0x34e   : > { %1914 = vmatpush1.bf16.msra.mxu0 %v1559_v63  ;;  %1958 = vmatprep.subr.bf16.mxu1 %v2838_v21  ;;  %v1796_v21 = vld [vmem:[%s3085_s2 + $0x18] sm:$0x11]  ;;  %v1650_v43 = vsel %vm931_vm7, %v1644_v59, %v1646_v40  ;;  %v1651_v53 = vsel %vm931_vm7, %v1646_v40, %v1648_v6  ;;  %v1815_v62 = vpack.i.b16 %v2265_v46, %v2265_v46 }
 0x34f   : > { %1915 = vmatprep.subr.bf16.mxu0 %v2830_v17  ;;  %v1657_v17 = vsel %vm931_vm7, %v1648_v6, %v2930_v33  ;;  %v2266_v56 = vcombine.low %v1796_v21, %v1796_v21  ;;  %v2267_v45 = vcombine.high %v1796_v21, %v1796_v21  ;;  %v1700_v27 = vmul.bf16 %v1684_v60, %v1650_v43 }
 0x350   : > { %v1702_v54 = vmul.bf16 %v1698_v23, %v1657_v17  ;;  %v1701_v44 = vmul.bf16 %v1691_v49, %v1651_v53  ;;  %v1699_v59 = vmul.bf16 %v1677_v24, %v1649_v37  ;;  %v1808_v4 = vpack.i.b16 %v2264_v55, %v2264_v55  ;;  %v2369_v23 = vld [vmem:[%s3088_s5 + $0x10] ss:$8 sps:$4 sm:$0xff]  }
 0x351   : > { %v1708_v36 = vpop.permute.xlu0 %1707  ;;  %1959 = vmatpush1.bf16.msra.mxu1 %v2832_v20  ;;  %v1710_v19 = vpop.permute.xlu1 %1709  ;;  %v1633_v20 = vmul.bf16 %v1608_v48, %v1579_v38  ;;  %v1822_v41 = vpack.i.b16 %v2266_v56, %v2266_v56  ;;  %v1829_v33 = vpack.i.b16 %v2267_v45, %v2267_v45  ;;  %v1820_v13 = vrot.slane %v1815_v62, %v2475_v9 }
 0x352   : > { %1916 = vmatpush1.bf16.msra.mxu0 %v2828_v28  ;;  %1960 = vmatprep.subr.bf16.mxu1 %v1636_v39  ;;  %v1715_v14 = vsel %vm999_vm8, %v1708_v36, %v1710_v19  ;;  %v1813_v32 = vrot.slane %v1808_v4, %v2475_v9 }
 0x353   : > { %1917 = vmatprep.subr.bf16.mxu0 %v1634_v5  ;;  %v1827_v26 = vrot.slane %v1822_v41, %v2475_v9  ;;  %v1834_v40 = vrot.slane %v1829_v33, %v2475_v9  ;;  %v1769_v6 = vmul.bf16 %v1744_v15, %v1715_v14 }
 0x355   : > { %v1712_v28 = vpop.permute.xlu0 %1711  ;;  %1961 = vmatpush1.bf16.msra.mxu1 %v1635_v18  ;;  %v1714_v25 = vpop.permute.xlu1 %1713 }
 0x356   : > { %v1716_v58 = vsel %vm999_vm8, %v1710_v19, %v1712_v28  ;;  %v1723_v2 = vsel %vm999_vm8, %v1714_v25, %v1708_v36  ;;  %1918 = vmatpush1.bf16.msra.mxu0 %v1633_v20  ;;  %1962 = vmatprep.subr.bf16.mxu1 %v1702_v54  ;;  %v1717_v31 = vsel %vm999_vm8, %v1712_v28, %v1714_v25 }
 0x357   : > { %v1772_v3 = vmul.bf16 %v1768_v0, %v1723_v2  ;;  %1919 = vmatprep.subr.bf16.mxu0 %v1700_v27  ;;  %v1770_v63 = vmul.bf16 %v1752_v52, %v1716_v58  ;;  %v1771_v16 = vmul.bf16 %v1760_v1, %v1717_v31 }
 0x359   : > { %v1778_v22 = vpop.permute.xlu0 %1777  ;;  %1963 = vmatpush1.bf16.msra.mxu1 %v1701_v44  ;;  %v1780_v57 = vpop.permute.xlu1 %1779 }
 0x35a   : > { %1920 = vmatpush1.bf16.msra.mxu0 %v1699_v59  ;;  %1964 = vmatprep.subr.bf16.mxu1 %v1772_v3  ;;  %v1785_v48 = vsel %vm1071_vm9, %v1778_v22, %v1780_v57 }
 0x35b   : > { %1921 = vmatprep.subr.bf16.mxu0 %v1770_v63  ;;  %v1835_v39 = vmul.bf16 %v1813_v32, %v1785_v48 }
 0x35d   : > { %v1782_v30 = vpop.permute.xlu0 %1781  ;;  %1965 = vmatpush1.bf16.msra.mxu1 %v1771_v16  ;;  %v1784_v50 = vpop.permute.xlu1 %1783 }
 0x35e   : > { %v1786_v29 = vsel %vm1071_vm9, %v1780_v57, %v1782_v30  ;;  %v1787_v24 = vsel %vm1071_vm9, %v1782_v30, %v1784_v50  ;;  %v1793_v60 = vsel %vm1071_vm9, %v1784_v50, %v1778_v22  ;;  %1922 = vmatpush1.bf16.msra.mxu0 %v1769_v6 }
 0x35f   : > { %v1836_v49 = vmul.bf16 %v1820_v13, %v1786_v29  ;;  %v1837_v61 = vmul.bf16 %v1827_v26, %v1787_v24  ;;  %v1838_v51 = vmul.bf16 %v1834_v40, %v1793_v60 }
 0x361   : > { %1923 = vmatprep.subr.bf16.mxu0 %v1836_v49  ;;  %1966 = vmatprep.subr.bf16.mxu1 %v1838_v51  ;;  %v2392_v51 = vmov 1966171168  }
 0x362   : > { %1924 = vmatpush1.bf16.msra.mxu0 %v1835_v39  ;;  %1967 = vmatpush1.bf16.msra.mxu1 %v1837_v61  ;;  %v2087_v39 = vunpack.c.l.s4 %v2392_v51 }
 0x365   : > { %1940 = vmatmul.mubr.bf16.vlgmr.msra.gmra.mrb[8].mxu0 %v2369_v23  ;;  %1983 = vmatmul.mubr.bf16.vlgmr.msra.gmra.mrb[8].mxu1 %v2369_v23 }
 0x36e   : > { %v1888_v34 = vpop.permute.xlu0 %1887  ;;  %v1893_v21 = vpop.permute.xlu1 %1892 }
 0x372   : > { %v2006_v1 = vpop.permute.xlu0 %2005  ;;  %v2011_v25 = vpop.permute.xlu1 %2010 }
 0x438   : > { %v1941_v38 = vpop.f32.mrb[8].mxu0  ;;  %v1984_v5 = vpop.f32.mrb[8].mxu1 }
 0x439   : > { %v1942_v17 = vadd.f32 %v1941_v38, %v1888_v34  ;;  %v1985_v36 = vadd.f32 %v1984_v5, %v1888_v34  ;;  %v1943_v19 = vpop.f32.mrb[9].mxu0  ;;  %v1986_v35 = vpop.f32.mrb[9].mxu1  ;;  %v2050_v38 = vstv %s2049_s16  ;;  %v2374_v5 = vld [vmem:[%s2468_s19] sm:$0xf] }
 0x43a   : > { %v1944_v42 = vadd.f32 %v1943_v19, %v1888_v34  ;;  %v1987_v43 = vadd.f32 %v1986_v35, %v1888_v34  ;;  %v1945_v47 = vpop.f32.mrb[10].mxu0  ;;  %v1988_v46 = vpop.f32.mrb[10].mxu1 }
 0x43b   : > { %v1993_v18 = vmax.f32 %v1942_v17, 0.0  ;;  %v1995_v0 = vmax.f32 %v1985_v36, 0.0  ;;  %v1946_v56 = vadd.f32 %v1945_v47, %v1893_v21  ;;  %v1989_v45 = vadd.f32 %v1988_v46, %v1893_v21  ;;  %v1947_v20 = vpop.f32.mrb[11].mxu0  ;;  %v1990_v53 = vpop.f32.mrb[11].mxu1 }
 0x43c   : > { %v1994_v54 = vmax.f32 %v1944_v42, 0.0  ;;  %v1996_v55 = vmax.f32 %v1987_v43, 0.0  ;;  %v1948_v37 = vadd.f32 %v1947_v20, %v1893_v21  ;;  %v1991_v27 = vadd.f32 %v1990_v53, %v1893_v21 }
 0x43d   : > { %v1997_v52 = vmax.f32 %v1946_v56, 0.0  ;;  %v1999_v28 = vmax.f32 %v1989_v45, 0.0  ;;  %v2013_v62 = vmul.f32 %v2006_v1, %v1993_v18  ;;  %v2015_v44 = vmul.f32 %v2006_v1, %v1995_v0 }
 0x43e   : > { %v1998_v58 = vmax.f32 %v1948_v37, 0.0  ;;  %v2000_v2 = vmax.f32 %v1991_v27, 0.0  ;;  %v2014_v33 = vmul.f32 %v2006_v1, %v1994_v54  ;;  %v2016_v59 = vmul.f32 %v2006_v1, %v1996_v55 }
 0x43f   : > { %v2017_v3 = vmul.f32 %v2011_v25, %v1997_v52  ;;  %v2019_v41 = vmul.f32 %v2011_v25, %v1999_v28  ;;  %v2059_v17 = vrot.slane %v2374_v5, %v2475_v9  ;;  %v2067_v43 = vrot.slane %v2374_v5, %v2481_v11 }
 0x440   : > { %v2018_v15 = vmul.f32 %v2011_v25, %v1998_v58  ;;  %v2020_v31 = vmul.f32 %v2011_v25, %v2000_v2  ;;  %v2063_v47 = vrot.slane %v2374_v5, %v2478_v10  ;;  %v2088_v18 = vunpack.c.0.s8 %v2087_v39 }
 0x441   : > { %v2021_v4 = vadd.f32 %v2017_v3, %v2013_v62  ;;  %v2035_v14 = vadd.f32 %v2019_v41, %v2015_v44  ;;  %v2071_v56 = vrot.slane %v2374_v5, %v2484_v12 }
 0x442   : > { %v2028_v63 = vadd.f32 %v2018_v15, %v2014_v33  ;;  %v2042_v22 = vadd.f32 %v2020_v31, %v2016_v59  ;;  %v2091_v27 = vsub.s32 %v2088_v18, %v2472_v8 }
 0x443   : > { %v2022_v57 = vrot.slane %v2021_v4, 4  ;;  %v2036_v16 = vrot.slane %v2035_v14, 4 }
 0x444   : > { %v2029_v13 = vrot.slane %v2028_v63, 4  ;;  %v2043_v26 = vrot.slane %v2042_v22, 4 }
 0x445   : > { %v2023_v40 = vadd.f32 %v2022_v57, %v2021_v4  ;;  %v2037_v6 = vadd.f32 %v2036_v16, %v2035_v14 }
 0x446   : > { %v2030_v32 = vadd.f32 %v2029_v13, %v2028_v63  ;;  %v2044_v48 = vadd.f32 %v2043_v26, %v2042_v22 }
 0x447   : > { %v2024_v30 = vrot.slane %v2023_v40, 2  ;;  %v2038_v50 = vrot.slane %v2037_v6, 2 }
 0x448   : > { %v2031_v29 = vrot.slane %v2030_v32, 2  ;;  %v2045_v24 = vrot.slane %v2044_v48, 2 }
 0x449   : > { %v2025_v60 = vadd.f32 %v2024_v30, %v2023_v40  ;;  %v2039_v49 = vadd.f32 %v2038_v50, %v2037_v6 }
 0x44a   : > { %v2032_v61 = vadd.f32 %v2031_v29, %v2030_v32  ;;  %v2046_v23 = vadd.f32 %v2045_v24, %v2044_v48 }
 0x44b   : > { %v2026_v34 = vrot.slane %v2025_v60, 1  ;;  %v2040_v21 = vrot.slane %v2039_v49, 1 }
 0x44c   : > { %v2033_v36 = vrot.slane %v2032_v61, 1  ;;  %v2047_v19 = vrot.slane %v2046_v23, 1 }
 0x44d   : > { %v2027_v35 = vadd.f32 %v2026_v34, %v2025_v60  ;;  %v2041_v42 = vadd.f32 %v2040_v21, %v2039_v49 }
 0x44e   : > { %v2034_v46 = vadd.f32 %v2033_v36, %v2032_v61  ;;  %v2048_v0 = vadd.f32 %v2047_v19, %v2046_v23 }
 0x44f   : > { %v2051_v45 = vadd.f32 %v2050_v38, %v2027_v35  ;;  %v2053_v20 = vadd.f32 %v2050_v38, %v2041_v42 }
 0x450   : > { %v2052_v53 = vadd.f32 %v2050_v38, %v2034_v46  ;;  %v2054_v54 = vadd.f32 %v2050_v38, %v2048_v0 }
 0x451   : > { %v2076_v55 = vadd.f32 %v2059_v17, %v2051_v45  ;;  %v2078_v9 = vadd.f32 %v2067_v43, %v2053_v20 }
 0x452   : > { %v2077_v37 = vadd.f32 %v2063_v47, %v2052_v53  ;;  %v2079_v52 = vadd.f32 %v2071_v56, %v2054_v54 }
 0x454   : > { %v2084_v28 = vcombine.low %v2076_v55, %v2077_v37  ;;  %v2085_v11 = vcombine.low %v2078_v9, %v2079_v52 }
 0x456   : > { %v2092_v1 = vrot.slane %v2084_v28, %v2091_v27  ;;  %v2099_v10 = vrot.slane %v2085_v11, %v2091_v27 }
 0x458   : > { %v2100_v25 = vcombine.low %v2092_v1, %v2099_v10 }
 0x45a   : > { %v2107_v12 = vrot.slane %v2100_v25, %v2091_v27 }
 0x45c   : > { %2113 = vst.msk [vmem:[%s348_s13] sm:$0xf] %vm2111_vm10, %v2107_v12 }
 0x45d PF: > { %s20_s11 = sadd.s32 1, %s2381_s11  }
 0x45e   : > { %p17_p4 = scmp.ge.s32.totalorder %s20_s11, 4  }
 0x460   :  { %19 = sbr.rel (!%p17_p4) target bundleno = 2 (0x2), region = 91 }

</bundles_post_ra>
